<compile_context>
chip_gen: v6e
topology: v6e:2x2x1
jax: 0.10.0
libtpu: 0.0.40
codegen_flags: <defaults>
</compile_context>

<pallas_src>
import functools

import jax
import jax.numpy as jnp
from jax import lax
from jax.experimental import pallas as pl
from jax.experimental.pallas import tpu as pltpu


def _tile_start(t, th):
    """Row-tile start index; alignment hint only needed for traced indices."""
    r0 = t * th
    return r0 if isinstance(r0, int) else pl.multiple_of(r0, th)


def _bottleneck_kernel(x_ref, w1_ref, w2c_ref, w3_ref,
                       b1_ref, b2_ref, b3_ref,
                       out_ref, col_ref, *, th):
    """One batch image per grid step.

    x_ref / out_ref : (H, W, Cin)   activation dtype (bf16 or f32)
    w1_ref          : (Cin, P)      BN1 scale pre-folded
    w2c_ref         : (3, 3P, P)    3x3 weights packed as K=3P slabs per dh,
                                    BN2 scale pre-folded
    w3_ref          : (P, Cin)      BN3 scale pre-folded
    b*_ref          : (1, C)        folded BatchNorm bias (f32)
    col_ref         : (H+2, W, 3P)  width-im2col VMEM scratch, activation dtype
    """
    H, W, Cin = x_ref.shape
    P = w1_ref.shape[1]
    n_tiles = H // th
    cdt = x_ref.dtype

    # Tiny folded-BN biases: load once, keep live (cheap).
    b1 = b1_ref[...]
    b2 = b2_ref[...]
    b3 = b3_ref[...]

    # Zero only the 2-row height halo of the im2col scratch. Done every grid
    # step (O(W), negligible) so correctness never depends on which core ran
    # step 0 — the batch axis can stay "parallel".
    zrow = jnp.zeros((1, W, 3 * P), cdt)
    col_ref[0:1, :, :] = zrow
    col_ref[H + 1:H + 2, :, :] = zrow

    # ---- Stage A: conv1 (1x1) + bn1 + relu, row-tiled. Writes width-im2col
    # slabs (left / center / right width taps concatenated on the lane axis)
    # so conv2 needs no strided slice+reshape later.
    def stage_a(t, carry):
        r0 = _tile_start(t, th)
        xb = x_ref[pl.ds(r0, th), :, :].reshape(th * W, Cin)
        h1 = jnp.dot(xb, w1_ref[...], preferred_element_type=jnp.float32)
        h1 = jnp.maximum(h1 + b1, 0.0)          # scale already folded into w1
        h1 = h1.astype(cdt).reshape(th, W, P)
        zc = jnp.zeros((th, 1, P), cdt)
        left = jnp.concatenate([zc, h1[:, :W - 1, :]], axis=1)   # tap dw=0
        right = jnp.concatenate([h1[:, 1:, :], zc], axis=1)      # tap dw=2
        col_ref[pl.ds(r0 + 1, th), :, :] = jnp.concatenate(
            [left, h1, right], axis=2)                           # (th, W, 3P)
        return carry

    # ---- Stage B: conv2 (3 aligned matmuls with K=3P) + bn2 + relu,
    # then conv3 (1x1) + bn3 + residual + relu, row-tiled.
    def stage_b(t, carry):
        r0 = _tile_start(t, th)
        acc = None
        for dh in range(3):  # static unroll; accumulator seeded by first tap
            band = col_ref[pl.ds(r0 + dh, th), :, :].reshape(th * W, 3 * P)
            tap = jnp.dot(band, w2c_ref[dh],
                          preferred_element_type=jnp.float32)
            acc = tap if acc is None else acc + tap
        h2 = jnp.maximum(acc + b2, 0.0).astype(cdt)   # scale folded into w2
        h3 = jnp.dot(h2, w3_ref[...], preferred_element_type=jnp.float32)
        # Residual re-read here (not kept live from the top of the kernel).
        res = x_ref[pl.ds(r0, th), :, :].reshape(th * W, Cin).astype(jnp.float32)
        out = jnp.maximum(h3 + b3 + res, 0.0)         # scale folded into w3
        out_ref[pl.ds(r0, th), :, :] = out.reshape(th, W, Cin).astype(out_ref.dtype)
        return carry

    def run_tiles(body):
        if n_tiles <= 4:
            # Full trace-time unroll: straight-line code, full LLO visibility.
            for t in range(n_tiles):
                body(t, 0)
        else:
            # Longer loops: fori_loop bounds vector live ranges / working set.
            lax.fori_loop(0, n_tiles, body, 0)

    run_tiles(stage_a)
    run_tiles(stage_b)


def _pick_row_tile(H, W, target_rows=256):
    """Largest divisor of H with th*W <= ~target_rows (MXU-friendly M)."""
    th = max(1, min(H, target_rows // max(W, 1)))
    while H % th:
        th -= 1
    return th


def bottleneck_pallas_nhwc(x, w1, w2, w3, s1, b1, s2, b2, s3, b3, *,
                           row_tile=None):
    """Fused Bottleneck forward on NHWC activations.

    x: (N, H, W, Cin); w1: (Cin, P); w2: (3, 3, P, P) HWIO; w3: (P, Cin);
    s*/b*: (1, C) folded BatchNorm scale/bias.
    """
    # TODO(synk): stride>1 / dilation>1 / downsample variants of the module are
    # not implemented; this covers the default identity-residual path.
    N, H, W, Cin = x.shape
    P = w1.shape[1]
    assert w2.shape == (3, 3, P, P) and w3.shape == (P, Cin)
    cdt = x.dtype

    if row_tile is None:
        th = _pick_row_tile(H, W)
    else:
        th = min(max(row_tile, 1), H)
        while H % th:
            th -= 1

    f32 = jnp.float32
    s1, b1, s2, b2, s3, b3 = (a.astype(f32) for a in (s1, b1, s2, b2, s3, b3))

    # Conv+BN folding: per-output-channel BN scale folded into the conv weights
    # (tiny host-side op on constant-sized tensors); only the bias stays in the
    # kernel epilogue. MXU operands in the activation dtype (bf16 halves
    # VMEM/vreg footprint and runs the MXU 2-4x faster than f32).
    w1c = (w1.astype(f32) * s1).astype(cdt)                               # (Cin, P)
    w2c = (w2.astype(f32) * s2.reshape(1, 1, 1, P)).reshape(3, 3 * P, P).astype(cdt)
    w3c = (w3.astype(f32) * s3).astype(cdt)                               # (P, Cin)

    # Explicit VMEM budget: double-buffered x/out blocks + im2col scratch +
    # weights, with 2x headroom. Re-derived per shape (relevant on v7x 64 MiB).
    item = jnp.dtype(cdt).itemsize
    vmem_need = (4 * H * W * Cin * item
                 + (H + 2) * W * 3 * P * item
                 + 2 * (w1c.size + w2c.size + w3c.size) * item
                 + 3 * 4 * (2 * P + Cin))
    vmem_limit = int(min(max(2 * vmem_need, 16 << 20), 32 << 20))

    def full(a):
        return pl.BlockSpec(a.shape, lambda b: (0,) * a.ndim)

    return pl.pallas_call(
        functools.partial(_bottleneck_kernel, th=th),
        out_shape=jax.ShapeDtypeStruct((N, H, W, Cin), cdt),
        grid=(N,),
        in_specs=[
            pl.BlockSpec((None, H, W, Cin), lambda b: (b, 0, 0, 0)),
            full(w1c), full(w2c), full(w3c),
            full(b1), full(b2), full(b3),
        ],
        out_specs=pl.BlockSpec((None, H, W, Cin), lambda b: (b, 0, 0, 0)),
        scratch_shapes=[pltpu.VMEM((H + 2, W, 3 * P), cdt)],
        compiler_params=pltpu.CompilerParams(
            dimension_semantics=("parallel",),
            vmem_limit_bytes=vmem_limit),
    )(x, w1c, w2c, w3c, b1, b2, b3)


def bottleneck_pallas_nchw(x_nchw, *params, **kw):
    """PyTorch-layout convenience wrapper (layout glue only; prefer the NHWC
    entry point to avoid the two HBM-round-trip transposes)."""
    x = jnp.transpose(x_nchw, (0, 2, 3, 1))
    out = bottleneck_pallas_nhwc(x, *params, **kw)
    return jnp.transpose(out, (0, 3, 1, 2))


def bottleneck_reference_nhwc(x, w1, w2, w3, s1, b1, s2, b2, s3, b3):
    """Pure-JAX reference (lax convs), NHWC, f32."""
    Cin, P = w1.shape
    xf = x.astype(jnp.float32)
    dn = ("NHWC", "HWIO", "NHWC")
    h = lax.conv_general_dilated(xf, w1.reshape(1, 1, Cin, P), (1, 1), "VALID",
                                 dimension_numbers=dn)
    h = jnp.maximum(h * s1 + b1, 0.0)
    h = lax.conv_general_dilated(h, w2, (1, 1), ((1, 1), (1, 1)),
                                 dimension_numbers=dn)
    h = jnp.maximum(h * s2 + b2, 0.0)
    h = lax.conv_general_dilated(h, w3.reshape(1, 1, P, Cin), (1, 1), "VALID",
                                 dimension_numbers=dn)
    return jnp.maximum(h * s3 + b3 + xf, 0.0)


if __name__ == "__main__":
    # Small shapes consistent with the module: inplanes = planes * 4 so the
    # identity residual is valid (downsample=None, stride=1, dilation=1).
    N, planes = 2, 4
    inplanes = planes * 4          # 16
    H = W = 16
    eps = 1e-5

    key = jax.random.PRNGKey(0)
    ks = jax.random.split(key, 10)

    # Deterministic params in PyTorch layouts, converted to kernel layouts.
    w1_oihw = jax.random.normal(ks[0], (planes, inplanes, 1, 1), jnp.float32) * 0.1
    w2_oihw = jax.random.normal(ks[1], (planes, planes, 3, 3), jnp.float32) * 0.1
    w3_oihw = jax.random.normal(ks[2], (inplanes, planes, 1, 1), jnp.float32) * 0.1
    w1 = jnp.transpose(w1_oihw[:, :, 0, 0], (1, 0))          # (Cin, P)
    w2 = jnp.transpose(w2_oihw, (2, 3, 1, 0))                # (3, 3, Pin, Pout) HWIO
    w3 = jnp.transpose(w3_oihw[:, :, 0, 0], (1, 0))          # (P, Cin)

    # BatchNorm (eval mode): running_mean=0, running_var=1; affine params random.
    def bn_fold(kg, kb, c):
        gamma = 1.0 + 0.1 * jax.random.normal(kg, (c,), jnp.float32)
        beta = 0.1 * jax.random.normal(kb, (c,), jnp.float32)
        scale = gamma / jnp.sqrt(1.0 + eps)
        return scale.reshape(1, c), beta.reshape(1, c)

    s1, b1 = bn_fold(ks[3], ks[4], planes)
    s2, b2 = bn_fold(ks[5], ks[6], planes)
    s3, b3 = bn_fold(ks[7], ks[8], inplanes)

    x = jax.random.normal(ks[9], (N, H, W, inplanes), jnp.float32)   # NHWC
    params = (w1, w2, w3, s1, b1, s2, b2, s3, b3)

    # f32 path: strict check against the lax reference.
    out = jax.block_until_ready(bottleneck_pallas_nhwc(x, *params))
    ref = bottleneck_reference_nhwc(x, *params)
    assert out.shape == (N, H, W, inplanes)
    assert jnp.allclose(out, ref, atol=1e-4, rtol=1e-4), \
        f"f32 max abs err = {jnp.max(jnp.abs(out - ref))}"

    # Also exercise the multi-tile (fori_loop / larger-tile) path explicitly.
    out_rt = jax.block_until_ready(bottleneck_pallas_nhwc(x, *params, row_tile=4))
    assert jnp.allclose(out_rt, ref, atol=1e-4, rtol=1e-4), \
        f"row_tile=4 max abs err = {jnp.max(jnp.abs(out_rt - ref))}"

    # bf16 path: activations/weights feed the MXU in bf16, f32 accumulation.
    out16 = bottleneck_pallas_nhwc(x.astype(jnp.bfloat16), *params)
    out16 = jax.block_until_ready(out16).astype(jnp.float32)
    assert jnp.allclose(out16, ref, atol=5e-2, rtol=5e-2), \
        f"bf16 max abs err = {jnp.max(jnp.abs(out16 - ref))}"

    # PyTorch-layout (NCHW) compatibility wrapper.
    out_nchw = jax.block_until_ready(
        bottleneck_pallas_nchw(jnp.transpose(x, (0, 3, 1, 2)), *params))
    assert jnp.allclose(jnp.transpose(out_nchw, (0, 2, 3, 1)), out,
                        atol=1e-5, rtol=1e-5)

    print("KERNEL_OK")
</pallas_src>

<mosaic_0001>
module attributes {stable_mosaic.version = 11 : i64} {
  func.func @_bottleneck_kernel(%arg0: i32, %arg1: memref<1x16x16x16xf32, #tpu.memory_space<vmem>>, %arg2: memref<16x4xf32, #tpu.memory_space<vmem>>, %arg3: memref<3x12x4xf32, #tpu.memory_space<vmem>>, %arg4: memref<4x16xf32, #tpu.memory_space<vmem>>, %arg5: memref<1x4xf32, #tpu.memory_space<vmem>>, %arg6: memref<1x4xf32, #tpu.memory_space<vmem>>, %arg7: memref<1x16xf32, #tpu.memory_space<vmem>>, %arg8: memref<1x16x16x16xf32, #tpu.memory_space<vmem>>, %arg9: memref<18x16x12xf32, #tpu.memory_space<vmem>>) attributes {dimension_semantics = [#tpu.dimension_semantics<parallel>], iteration_bounds = array<i64: 2>, scalar_prefetch = 0 : i64, scratch_operands = 1 : i64, tpu.core_type = #tpu.core_type<tc>, window_params = [{transform_indices = @transform_0, window_bounds = array<i64: 1, 16, 16, 16>}, {pipeline_mode = #tpu.pipeline_mode<synchronous>, transform_indices = @transform_1, window_bounds = array<i64: 16, 4>}, {pipeline_mode = #tpu.pipeline_mode<synchronous>, transform_indices = @transform_2, window_bounds = array<i64: 3, 12, 4>}, {pipeline_mode = #tpu.pipeline_mode<synchronous>, transform_indices = @transform_3, window_bounds = array<i64: 4, 16>}, {pipeline_mode = #tpu.pipeline_mode<synchronous>, transform_indices = @transform_4, window_bounds = array<i64: 1, 4>}, {pipeline_mode = #tpu.pipeline_mode<synchronous>, transform_indices = @transform_5, window_bounds = array<i64: 1, 4>}, {pipeline_mode = #tpu.pipeline_mode<synchronous>, transform_indices = @transform_6, window_bounds = array<i64: 1, 16>}, {transform_indices = @transform_7, window_bounds = array<i64: 1, 16, 16, 16>}]} {
    %c0 = arith.constant 0 : index
    %c0_0 = arith.constant 0 : index
    %0 = vector.load %arg5[%c0, %c0_0] : memref<1x4xf32, #tpu.memory_space<vmem>>, vector<1x4xf32>
    %c0_1 = arith.constant 0 : index
    %c0_2 = arith.constant 0 : index
    %1 = vector.load %arg6[%c0_1, %c0_2] : memref<1x4xf32, #tpu.memory_space<vmem>>, vector<1x4xf32>
    %c0_3 = arith.constant 0 : index
    %c0_4 = arith.constant 0 : index
    %2 = vector.load %arg7[%c0_3, %c0_4] : memref<1x16xf32, #tpu.memory_space<vmem>>, vector<1x16xf32>
    %cst = arith.constant 0.000000e+00 : f32
    %3 = vector.broadcast %cst : f32 to vector<1x16x12xf32>
    %c0_5 = arith.constant 0 : index
    %c0_6 = arith.constant 0 : index
    %c0_7 = arith.constant 0 : index
    %4 = vector.load %arg9[%c0_5, %c0_6, %c0_7] : memref<18x16x12xf32, #tpu.memory_space<vmem>>, vector<1x16x12xf32>
    tpu.vector_store %arg9[%c0_5, %c0_6, %c0_7], %3 {strides = array<i32>} : memref<18x16x12xf32, #tpu.memory_space<vmem>>, vector<1x16x12xf32>,
    %c17 = arith.constant 17 : index
    %c0_8 = arith.constant 0 : index
    %c0_9 = arith.constant 0 : index
    %5 = vector.load %arg9[%c17, %c0_8, %c0_9] : memref<18x16x12xf32, #tpu.memory_space<vmem>>, vector<1x16x12xf32>
    tpu.vector_store %arg9[%c17, %c0_8, %c0_9], %3 {strides = array<i32>} : memref<18x16x12xf32, #tpu.memory_space<vmem>>, vector<1x16x12xf32>,
    %c0_10 = arith.constant 0 : index
    %c0_11 = arith.constant 0 : index
    %c0_12 = arith.constant 0 : index
    %c0_13 = arith.constant 0 : index
    %6 = vector.load %arg1[%c0_10, %c0_11, %c0_12, %c0_13] : memref<1x16x16x16xf32, #tpu.memory_space<vmem>>, vector<1x16x16x16xf32>
    %7 = vector.shape_cast %6 : vector<1x16x16x16xf32> to vector<16x16x16xf32>
    %8 = vector.shape_cast %7 : vector<16x16x16xf32> to vector<256x16xf32>
    %c0_14 = arith.constant 0 : index
    %c0_15 = arith.constant 0 : index
    %9 = vector.load %arg2[%c0_14, %c0_15] : memref<16x4xf32, #tpu.memory_space<vmem>>, vector<16x4xf32>
    %cst_16 = arith.constant dense<0.000000e+00> : vector<256x4xf32>
    %10 = tpu.matmul %8, %9, %cst_16 {dimension_numbers = #tpu.dot_dimension_numbers<[1], [0], [0], [1], [0, 0, 1, 1], [], []>} : vector<256x16xf32>, vector<16x4xf32>, vector<256x4xf32> -> vector<256x4xf32>
    %11 = vector.broadcast %0 : vector<1x4xf32> to vector<256x4xf32>
    %12 = arith.addf %10, %11 : vector<256x4xf32>
    %cst_17 = arith.constant 0.000000e+00 : f32
    %13 = vector.broadcast %cst_17 : f32 to vector<256x4xf32>
    %14 = arith.maximumf %12, %13 : vector<256x4xf32>
    %15 = vector.shape_cast %14 : vector<256x4xf32> to vector<16x16x4xf32>
    %cst_18 = arith.constant 0.000000e+00 : f32
    %16 = vector.broadcast %cst_18 : f32 to vector<16x1x4xf32>
    %17 = vector.extract_strided_slice %15 {offsets = [0, 0, 0], sizes = [16, 15, 4], strides = [1, 1, 1]} : vector<16x16x4xf32> to vector<16x15x4xf32>
    %18 = tpu.concatenate %16, %17 in 1 : vector<16x1x4xf32>, vector<16x15x4xf32> -> vector<16x16x4xf32>
    %19 = vector.extract_strided_slice %15 {offsets = [0, 1, 0], sizes = [16, 15, 4], strides = [1, 1, 1]} : vector<16x16x4xf32> to vector<16x15x4xf32>
    %20 = tpu.concatenate %19, %16 in 1 : vector<16x15x4xf32>, vector<16x1x4xf32> -> vector<16x16x4xf32>
    %21 = tpu.concatenate %18, %15, %20 in 2 : vector<16x16x4xf32>, vector<16x16x4xf32>, vector<16x16x4xf32> -> vector<16x16x12xf32>
    %c1 = arith.constant 1 : index
    %c0_19 = arith.constant 0 : index
    %c0_20 = arith.constant 0 : index
    %22 = vector.load %arg9[%c1, %c0_19, %c0_20] : memref<18x16x12xf32, #tpu.memory_space<vmem>>, vector<16x16x12xf32>
    tpu.vector_store %arg9[%c1, %c0_19, %c0_20], %21 {strides = array<i32>} : memref<18x16x12xf32, #tpu.memory_space<vmem>>, vector<16x16x12xf32>,
    %c0_21 = arith.constant 0 : index
    %c0_22 = arith.constant 0 : index
    %c0_23 = arith.constant 0 : index
    %23 = vector.load %arg9[%c0_21, %c0_22, %c0_23] : memref<18x16x12xf32, #tpu.memory_space<vmem>>, vector<16x16x12xf32>
    %24 = vector.shape_cast %23 : vector<16x16x12xf32> to vector<256x12xf32>
    %c0_24 = arith.constant 0 : index
    %c0_25 = arith.constant 0 : index
    %c0_26 = arith.constant 0 : index
    %25 = vector.load %arg3[%c0_24, %c0_25, %c0_26] : memref<3x12x4xf32, #tpu.memory_space<vmem>>, vector<1x12x4xf32>
    %26 = vector.shape_cast %25 : vector<1x12x4xf32> to vector<12x4xf32>
    %cst_27 = arith.constant dense<0.000000e+00> : vector<256x4xf32>
    %27 = tpu.matmul %24, %26, %cst_27 {dimension_numbers = #tpu.dot_dimension_numbers<[1], [0], [0], [1], [0, 0, 1, 1], [], []>} : vector<256x12xf32>, vector<12x4xf32>, vector<256x4xf32> -> vector<256x4xf32>
    %c1_28 = arith.constant 1 : index
    %c0_29 = arith.constant 0 : index
    %c0_30 = arith.constant 0 : index
    %28 = vector.load %arg9[%c1_28, %c0_29, %c0_30] : memref<18x16x12xf32, #tpu.memory_space<vmem>>, vector<16x16x12xf32>
    %29 = vector.shape_cast %28 : vector<16x16x12xf32> to vector<256x12xf32>
    %c1_31 = arith.constant 1 : index
    %c0_32 = arith.constant 0 : index
    %c0_33 = arith.constant 0 : index
    %30 = vector.load %arg3[%c1_31, %c0_32, %c0_33] : memref<3x12x4xf32, #tpu.memory_space<vmem>>, vector<1x12x4xf32>
    %31 = vector.shape_cast %30 : vector<1x12x4xf32> to vector<12x4xf32>
    %cst_34 = arith.constant dense<0.000000e+00> : vector<256x4xf32>
    %32 = tpu.matmul %29, %31, %cst_34 {dimension_numbers = #tpu.dot_dimension_numbers<[1], [0], [0], [1], [0, 0, 1, 1], [], []>} : vector<256x12xf32>, vector<12x4xf32>, vector<256x4xf32> -> vector<256x4xf32>
    %33 = arith.addf %27, %32 : vector<256x4xf32>
    %c2 = arith.constant 2 : index
    %c0_35 = arith.constant 0 : index
    %c0_36 = arith.constant 0 : index
    %34 = vector.load %arg9[%c2, %c0_35, %c0_36] : memref<18x16x12xf32, #tpu.memory_space<vmem>>, vector<16x16x12xf32>
    %35 = vector.shape_cast %34 : vector<16x16x12xf32> to vector<256x12xf32>
    %c2_37 = arith.constant 2 : index
    %c0_38 = arith.constant 0 : index
    %c0_39 = arith.constant 0 : index
    %36 = vector.load %arg3[%c2_37, %c0_38, %c0_39] : memref<3x12x4xf32, #tpu.memory_space<vmem>>, vector<1x12x4xf32>
    %37 = vector.shape_cast %36 : vector<1x12x4xf32> to vector<12x4xf32>
    %cst_40 = arith.constant dense<0.000000e+00> : vector<256x4xf32>
    %38 = tpu.matmul %35, %37, %cst_40 {dimension_numbers = #tpu.dot_dimension_numbers<[1], [0], [0], [1], [0, 0, 1, 1], [], []>} : vector<256x12xf32>, vector<12x4xf32>, vector<256x4xf32> -> vector<256x4xf32>
    %39 = arith.addf %33, %38 : vector<256x4xf32>
    %40 = vector.broadcast %1 : vector<1x4xf32> to vector<256x4xf32>
    %41 = arith.addf %39, %40 : vector<256x4xf32>
    %cst_41 = arith.constant 0.000000e+00 : f32
    %42 = vector.broadcast %cst_41 : f32 to vector<256x4xf32>
    %43 = arith.maximumf %41, %42 : vector<256x4xf32>
    %c0_42 = arith.constant 0 : index
    %c0_43 = arith.constant 0 : index
    %44 = vector.load %arg4[%c0_42, %c0_43] : memref<4x16xf32, #tpu.memory_space<vmem>>, vector<4x16xf32>
    %cst_44 = arith.constant dense<0.000000e+00> : vector<256x16xf32>
    %45 = tpu.matmul %43, %44, %cst_44 {dimension_numbers = #tpu.dot_dimension_numbers<[1], [0], [0], [1], [0, 0, 1, 1], [], []>} : vector<256x4xf32>, vector<4x16xf32>, vector<256x16xf32> -> vector<256x16xf32>
    %c0_45 = arith.constant 0 : index
    %c0_46 = arith.constant 0 : index
    %c0_47 = arith.constant 0 : index
    %c0_48 = arith.constant 0 : index
    %46 = vector.load %arg1[%c0_45, %c0_46, %c0_47, %c0_48] : memref<1x16x16x16xf32, #tpu.memory_space<vmem>>, vector<1x16x16x16xf32>
    %47 = vector.shape_cast %46 : vector<1x16x16x16xf32> to vector<16x16x16xf32>
    %48 = vector.shape_cast %47 : vector<16x16x16xf32> to vector<256x16xf32>
    %49 = vector.broadcast %2 : vector<1x16xf32> to vector<256x16xf32>
    %50 = arith.addf %45, %49 : vector<256x16xf32>
    %51 = arith.addf %50, %48 : vector<256x16xf32>
    %cst_49 = arith.constant 0.000000e+00 : f32
    %52 = vector.broadcast %cst_49 : f32 to vector<256x16xf32>
    %53 = arith.maximumf %51, %52 : vector<256x16xf32>
    %54 = vector.shape_cast %53 : vector<256x16xf32> to vector<16x16x16xf32>
    %c0_50 = arith.constant 0 : index
    %c0_51 = arith.constant 0 : index
    %c0_52 = arith.constant 0 : index
    %c0_53 = arith.constant 0 : index
    %55 = vector.load %arg8[%c0_50, %c0_51, %c0_52, %c0_53] : memref<1x16x16x16xf32, #tpu.memory_space<vmem>>, vector<1x16x16x16xf32>
    %56 = vector.shape_cast %55 : vector<1x16x16x16xf32> to vector<16x16x16xf32>
    %57 = vector.shape_cast %54 : vector<16x16x16xf32> to vector<1x16x16x16xf32>
    tpu.vector_store %arg8[%c0_50, %c0_51, %c0_52, %c0_53], %57 {strides = array<i32>} : memref<1x16x16x16xf32, #tpu.memory_space<vmem>>, vector<1x16x16x16xf32>,
    return
  }
  func.func @transform_0(%arg0: i32) -> (i32, i32, i32, i32) {
    %c0_i32 = arith.constant 0 : i32
    %c0_i32_0 = arith.constant 0 : i32
    %c0_i32_1 = arith.constant 0 : i32
    %c0_i32_2 = arith.constant 0 : i32
    return %arg0, %c0_i32, %c0_i32_0, %c0_i32_1 : i32, i32, i32, i32
  }
  func.func @transform_1(%arg0: i32) -> (i32, i32) {
    %c0_i32 = arith.constant 0 : i32
    %c0_i32_0 = arith.constant 0 : i32
    %c0_i32_1 = arith.constant 0 : i32
    return %c0_i32, %c0_i32_0 : i32, i32
  }
  func.func @transform_2(%arg0: i32) -> (i32, i32, i32) {
    %c0_i32 = arith.constant 0 : i32
    %c0_i32_0 = arith.constant 0 : i32
    %c0_i32_1 = arith.constant 0 : i32
    %c0_i32_2 = arith.constant 0 : i32
    return %c0_i32, %c0_i32_0, %c0_i32_1 : i32, i32, i32
  }
  func.func @transform_3(%arg0: i32) -> (i32, i32) {
    %c0_i32 = arith.constant 0 : i32
    %c0_i32_0 = arith.constant 0 : i32
    %c0_i32_1 = arith.constant 0 : i32
    return %c0_i32, %c0_i32_0 : i32, i32
  }
  func.func @transform_4(%arg0: i32) -> (i32, i32) {
    %c0_i32 = arith.constant 0 : i32
    %c0_i32_0 = arith.constant 0 : i32
    %c0_i32_1 = arith.constant 0 : i32
    return %c0_i32, %c0_i32_0 : i32, i32
  }
  func.func @transform_5(%arg0: i32) -> (i32, i32) {
    %c0_i32 = arith.constant 0 : i32
    %c0_i32_0 = arith.constant 0 : i32
    %c0_i32_1 = arith.constant 0 : i32
    return %c0_i32, %c0_i32_0 : i32, i32
  }
  func.func @transform_6(%arg0: i32) -> (i32, i32) {
    %c0_i32 = arith.constant 0 : i32
    %c0_i32_0 = arith.constant 0 : i32
    %c0_i32_1 = arith.constant 0 : i32
    return %c0_i32, %c0_i32_0 : i32, i32
  }
  func.func @transform_7(%arg0: i32) -> (i32, i32, i32, i32) {
    %c0_i32 = arith.constant 0 : i32
    %c0_i32_0 = arith.constant 0 : i32
    %c0_i32_1 = arith.constant 0 : i32
    %c0_i32_2 = arith.constant 0 : i32
    return %arg0, %c0_i32, %c0_i32_0, %c0_i32_1 : i32, i32, i32, i32
  }
}

</mosaic_0001>

<bundles_post_ra>
// kernel: tpu_custom_call.1
= control target key start
LH: loop header
LB: loop body
LE: loop exit
PB: predicated region body
PF: predicated region fallthrough
CT: control target
= control target key end

     0   :  { %12 = vsyncpa [#allocation4], 0  ;;  %s5082_s0 = inlined_call_operand.hbm [shape: f32[2,16,16,16], index: 0, kind: input, shape index: {}]   ;;  %s5083_s1 = inlined_call_operand.vmem [shape: f32[16,4], index: 1, kind: input, shape index: {}]   ;;  %s5084_s2 = inlined_call_operand.vmem [shape: f32[3,12,4], index: 2, kind: input, shape index: {}]   ;;  %s5085_s3 = inlined_call_operand.vmem [shape: f32[4,16], index: 3, kind: input, shape index: {}]   ;;  %s5086_s4 = inlined_call_operand.vmem [shape: f32[1,4], index: 4, kind: input, shape index: {}]   ;;  %s5087_s5 = inlined_call_operand.vmem [shape: f32[1,4], index: 5, kind: input, shape index: {}]   ;;  %s5088_s6 = inlined_call_operand.vmem [shape: f32[1,16], index: 6, kind: input, shape index: {}]   ;;  %s5089_s7 = inlined_call_operand.hbm [shape: f32[2,16,16,16], index: 7, kind: output, shape index: {}]  }
   0x1   :  { %14 = vsyncpa [#allocation4 + $0x1], 0 }
   0x2   :  { %15 = vsyncpa [#allocation5], 0 }
   0x3   :  { %17 = vsyncpa [#allocation5 + $0x1], 0  ;;  %s3755_s24 = smov 0   ;;  %s3757_s25 = smov 0  }
   0x4   :  { %s3759_s26 = smov 0   ;;  %s3761_s27 = smov 0  }
   0x5 LB: > { %s3776_s28 = sadd.s32 4294967295, %s3705_s27   ;;  %s2943_s29 = sadd.s32 4294967294, %s3705_s27   ;;  %s3705_s27 = sphi %s3761_s27, %s5106_s27   ;;  %s3701_s26 = sphi %s3759_s26, %s5105_s26   ;;  %s3697_s25 = sphi %s3757_s25, %s5104_s25   ;;  %s3693_s24 = sphi %s3755_s24, %s5103_s24  }
   0x6   : > { %s3780_s30 = sadd.s32 1, %s3705_s27   ;;  %s30_s8 = sadd.s32 1, %s3701_s26 }
   0x7   : > { %s27_s9 = ssub.s32 %s3705_s27, %s3780_s30  ;;  %p37_p0 = scmp.ne.s32.totalorder %s3701_s26, %s3697_s25 }
   0x8   : > { %p28_p1 = scmp.eq.s32.totalorder %s27_s9, 0  ;;  %p38_p2 = scmp.eq.s32.totalorder %s3705_s27, 0 }
   0x9   : > { %p43_p3 = scmp.ne.s32.totalorder %s3697_s25, %s3693_s24  ;;  %p44_p4 = scmp.eq.s32.totalorder %s3776_s28, 0 }
   0xa   : > { %s3792_s10 = scalar_select %p28_p1, %s3701_s26, %s30_s8  }
   0xb   : > { %p3794_p5 = por %p38_p2, %p37_p0  ;;  %p3798_p6 = por %p44_p4, %p43_p3 }
   0xc   : > { %p193_p7 = scmp.eq.s32.totalorder %s3776_s28, 1  ;;  %p199_p8 = scmp.eq.s32.totalorder %s2943_s29, 1 }
   0xd   : > { %s5093_s12 = scalar_select %p3798_p6, 1, 0 }
   0xe   : > { %p3573_p10 = scmp.lt.s32.totalorder %s3705_s27, 2  ;;  %p3805_p11 = por %p193_p7, %p37_p0 }
   0xf   : > { %p3809_p12 = por %p199_p8, %p43_p3  ;;  %s237_s15 = sand.u32 1, %s3701_s26  }
  0x10   : > { %s5094_s13 = scalar_select %p3805_p11, 1, 0 }
  0x11   : > { %s5095_s14 = scalar_select %p3809_p12, 1, 0 }
  0x12   : > { %s3128_s16 = sshll.u32 %s3705_s27, 12  ;;  %s2946_s17 = sshll.u32 %s237_s15, 8 }
  0x13   : > { %s3818_s20 = scalar_lea.hbm %s5082_s0, %s3128_s16  ;;  %s241_s21 = scalar_lea.vmem [#allocation3], %s2946_s17 }
  0x14   : > { %s248_s22 = sshll.u32 %s241_s21, 4  ;;  %p3822_p13 = pnand %p3573_p10, %p3794_p5  ;;  %s3826_s22 = int_to_ptr.vmem [resolvable:$true] %s248_s22 }
  0x15   : > { %s3828_s29 = scalar_lea.sflag [#allocation4], %s237_s15  ;;  %s3613_s8 = scalar_lea.hbm %s3818_s20, 4096 }
  0x16   : > { %p3614_p0 = scmp.ne.s32.totalorder %s3818_s20, %s3613_s8  ;;  %p3615_p1 = pneg %p3822_p13 }
  0x17   : > { %s3618_s17 = scalar_lea.hbm %s5082_s0, 8192  ;;  %p3619_p4 = scmp.lt.s32.totalorder %s3818_s20, %s5082_s0 }
  0x18   : > { %p3616_p2 = pnand %p3615_p1, %p3614_p0  ;;  %p3620_p5 = scmp.lt.s32.totalorder %s3618_s17, %s3613_s8 }
  0x1a   : > { %p3617_p3 = pneg %p3616_p2  ;;  %p3621_p7 = por %p3620_p5, %p3619_p4 }
  0x1c   : > { %p3622_p8 = pnand %p3621_p7, %p3617_p3 }
  0x1e   : > { %3625 = shalt.err (!%p3622_p8)
}
  0x1f   : > { %s3626_s15 = scalar_lea.vmem %s3826_s22, 4096  ;;  %s3707_s19 = smov [#allocation3]  }
  0x20   : > { %p3627_p10 = scmp.ne.s32.totalorder %s3826_s22, %s3626_s15  ;;  %s3631_s21 = sshll.u32 %s3707_s19, 4  ;;  %s3632_s21 = int_to_ptr.vmem [resolvable:$false] %s3631_s21 }
  0x21   : > { %s3633_s9 = scalar_lea.vmem %s3632_s21, 8192  ;;  %p3634_p2 = scmp.lt.s32.totalorder %s3826_s22, %s3632_s21 }
  0x22   : > { %p3629_p9 = pnand %p3627_p10, %p3615_p1  ;;  %p3635_p12 = scmp.lt.s32.totalorder %s3633_s9, %s3626_s15 }
  0x24   : > { %p3630_p0 = pneg %p3629_p9  ;;  %p3636_p11 = por %p3635_p12, %p3634_p2 }
  0x26   : > { %p3637_p6 = pnand %p3636_p11, %p3630_p0 }
  0x28   : > { %3640 = shalt.err (!%p3637_p6)
}
  0x29   : > { %s3708_s8 = smov 128   ;;  %s3709_s16 = smov 8  }
  0x2a   : > { %3568 = dma.hbm_to_vmem [thread:$0]  (!%p3822_p13), %s3818_s20, 4096, %s3826_s22, %s3828_s29, %s3708_s8, %s3708_s8, %s3709_s16  }
  0x2b   : > { %p2949_p9 = scmp.ge.s32.totalorder %s3705_s27, 1  ;;  %p256_p1 = scmp.lt.s32.totalorder %s3705_s27, 3 }
  0x2d   : > { %p257_p3 = pnand %p2949_p9, %p256_p1 }
  0x2f   : > { %260 = sbr.rel (%p257_p3) target bundleno = 989 (0x3dd), region = 48 }
  0x34   : > { %s3852_s17 = sand.u32 1, %s3697_s25   ;;  %p5097_p6 = scmp.ne.s32.totalorder %s5093_s12, 0 }
  0x35   : > { %s2950_s11 = sshll.u32 %s3852_s17, 8  ;;  %s263_s18 = scalar_lea.sflag [#allocation4], %s3852_s17 }
  0x36   : > { %s3858_s15 = scalar_lea.vmem [#allocation3], %s2950_s11 }
  0x37   : > { %3684 = dma.done.wait (%p5097_p6), %s263_s18, 4096  }
  0x38   : > { %3686 = vsyncadd (%p5097_p6), %s263_s18, 4294963200  ;;  %v339_v0 = vld [vmem:[%s5083_s1 + $0x8] sm:$0xff]  ;;  %v338_v1 = vld [vmem:[%s5083_s1] sm:$0xff]  ;;  %vm346_vm0 = vcmask 130048   ;;  %s3710_s21 = smov 4   ;;  %vm829_vm1 = vcmask 1046528  }
  0x39   : > { %3299 = vmatprep.subr.mxu0 %v339_v0  ;;  %3557 = vmatprep.subr.mxu1 %v339_v0  ;;  %v306_v2 = vld [vmem:[%s3858_s15] sm:$0xff]  ;;  %v307_v4 = vld [vmem:[%s3858_s15 + $0x8] sm:$0xff]  ;;  %v308_v6 = vld [vmem:[%s3858_s15 + $0x10] sm:$0xff]  ;;  %s3711_s9 = smov 8   ;;  %vm732_vm2 = vcmask 1040384   ;;  %vm300_vm3 = vcmask 97280  }
  0x3a   : > { %3300 = vmatpush3.msra.mxu0 %v339_v0  ;;  %3559 = vmatpush3.msra.mxu1 %v339_v0  ;;  %v322_v3 = vld [vmem:[%s3858_s15 + $0x80] sm:$0xff]  ;;  %v323_v5 = vld [vmem:[%s3858_s15 + $0x88] sm:$0xff]  ;;  %v324_v7 = vld [vmem:[%s3858_s15 + $0x90] sm:$0xff]  ;;  %vm1382_vm4 = vcmask 1043456   ;;  %vm1118_vm5 = vcmask 31744   ;;  %vm1151_vm6 = vcmask 64512  }
  0x3b   : > { %3301 = vmatprep.subr.mxu0 %v338_v1  ;;  %3558 = vmatprep.subr.mxu1 %v338_v1  ;;  %v309_v8 = vld [vmem:[%s3858_s15 + $0x18] sm:$0xff]  ;;  %v310_v10 = vld [vmem:[%s3858_s15 + $0x20] sm:$0xff]  ;;  %v311_v12 = vld [vmem:[%s3858_s15 + $0x28] sm:$0xff]  ;;  %s4908_s19 = scalar_lea.vmem [#allocation6], %s2950_s11  ;;  %s3129_s11 = sshll.u32 %s3776_s28, 12 }
  0x3c   : > { %3302 = vmatpush3.msra.mxu0 %v338_v1  ;;  %3560 = vmatpush3.msra.mxu1 %v338_v1  ;;  %v325_v9 = vld [vmem:[%s3858_s15 + $0x98] sm:$0xff]  ;;  %v326_v11 = vld [vmem:[%s3858_s15 + $0xa0] sm:$0xff]  ;;  %v327_v13 = vld [vmem:[%s3858_s15 + $0xa8] sm:$0xff]  ;;  %s2870_s8 = sshll.u32 %s4908_s19, 4  ;;  %s5032_s18 = scalar_lea.hbm %s5089_s7, %s3129_s11  ;;  %s5036_s8 = int_to_ptr.vmem [resolvable:$true] %s2870_s8 }
  0x3d   : > { %3303 = vmatprep.mubr.msk.f32.mxu0 %vm346_vm0, %v306_v2  ;;  %3327 = vmatprep.mubr.msk.f32.mxu1 %vm346_vm0, %v322_v3  ;;  %v312_v14 = vld [vmem:[%s3858_s15 + $0x30] sm:$0xff]  ;;  %v313_v16 = vld [vmem:[%s3858_s15 + $0x38] sm:$0xff]  ;;  %v314_v18 = vld [vmem:[%s3858_s15 + $0x40] sm:$0xff]  ;;  %s2857_s28 = scalar_lea.sflag [#allocation5], %s3852_s17  ;;  %p5100_p12 = scmp.ne.s32.totalorder %s5094_s13, 0 }
  0x3e   : > { %3304 = vmatmul.mubr.msk.f32.vlgmr.msra.gmra.mxu0 %vm346_vm0, %v307_v4  ;;  %3328 = vmatmul.mubr.msk.f32.vlgmr.msra.gmra.mxu1 %vm346_vm0, %v323_v5  ;;  %v328_v15 = vld [vmem:[%s3858_s15 + $0xb0] sm:$0xff]  ;;  %v329_v17 = vld [vmem:[%s3858_s15 + $0xb8] sm:$0xff]  ;;  %v330_v19 = vld [vmem:[%s3858_s15 + $0xc0] sm:$0xff]  ;;  %s3713_s20 = smov [#allocation6]  }
  0x3f   : > { %3306 = vmatprep.mubr.msk.f32.mxu0 %vm346_vm0, %v308_v6  ;;  %3330 = vmatprep.mubr.msk.f32.mxu1 %vm346_vm0, %v324_v7  ;;  %v315_v20 = vld [vmem:[%s3858_s15 + $0x48] sm:$0xff]  ;;  %v316_v22 = vld [vmem:[%s3858_s15 + $0x50] sm:$0xff]  ;;  %v317_v24 = vld [vmem:[%s3858_s15 + $0x58] sm:$0xff]  ;;  %s3645_s22 = sshll.u32 %s3713_s20, 4  ;;  %s3646_s22 = int_to_ptr.vmem [resolvable:$false] %s3645_s22 }
  0x40   : > { %v331_v21 = vld [vmem:[%s3858_s15 + $0xc8] sm:$0xff]  ;;  %v332_v23 = vld [vmem:[%s3858_s15 + $0xd0] sm:$0xff]  ;;  %v333_v25 = vld [vmem:[%s3858_s15 + $0xd8] sm:$0xff]  ;;  %s3647_s23 = scalar_lea.vmem %s3646_s22, 8192  ;;  %p3648_p5 = scmp.lt.s32.totalorder %s5036_s8, %s3646_s22 }
  0x41   : > { %v318_v26 = vld [vmem:[%s3858_s15 + $0x60] sm:$0xff]  ;;  %v319_v28 = vld [vmem:[%s3858_s15 + $0x68] sm:$0xff]  ;;  %v320_v30 = vld [vmem:[%s3858_s15 + $0x70] sm:$0xff] }
  0x42   : > { %3307 = vmatmul.mubr.msk.f32.gmra.mxu0 %vm346_vm0, %v309_v8  ;;  %3331 = vmatmul.mubr.msk.f32.gmra.mxu1 %vm346_vm0, %v325_v9  ;;  %v334_v27 = vld [vmem:[%s3858_s15 + $0xe0] sm:$0xff]  ;;  %v335_v29 = vld [vmem:[%s3858_s15 + $0xe8] sm:$0xff]  ;;  %v336_v31 = vld [vmem:[%s3858_s15 + $0xf0] sm:$0xff] }
  0x43   : > { %3309 = vmatprep.mubr.msk.f32.mxu0 %vm346_vm0, %v310_v10  ;;  %3333 = vmatprep.mubr.msk.f32.mxu1 %vm346_vm0, %v326_v11  ;;  %v321_v32 = vld [vmem:[%s3858_s15 + $0x78] sm:$0xff]  ;;  %v3937_v34 = vld [vmem:[%s5086_s4] ss:$0 sm:$0xff] }
  0x44   : > { %v337_v33 = vld [vmem:[%s3858_s15 + $0xf8] sm:$0xff] }
  0x46   : > { %3310 = vmatmul.mubr.msk.f32.gmra.mxu0 %vm346_vm0, %v311_v12  ;;  %3334 = vmatmul.mubr.msk.f32.gmra.mxu1 %vm346_vm0, %v327_v13 }
  0x47   : > { %3312 = vmatprep.mubr.msk.f32.mxu0 %vm346_vm0, %v312_v14  ;;  %3336 = vmatprep.mubr.msk.f32.mxu1 %vm346_vm0, %v328_v15 }
  0x4a   : > { %3313 = vmatmul.mubr.msk.f32.gmra.mxu0 %vm346_vm0, %v313_v16  ;;  %3337 = vmatmul.mubr.msk.f32.gmra.mxu1 %vm346_vm0, %v329_v17 }
  0x4b   : > { %3315 = vmatprep.mubr.msk.f32.mxu0 %vm346_vm0, %v314_v18  ;;  %3339 = vmatprep.mubr.msk.f32.mxu1 %vm346_vm0, %v330_v19 }
  0x4e   : > { %3316 = vmatmul.mubr.msk.f32.gmra.mxu0 %vm346_vm0, %v315_v20  ;;  %3340 = vmatmul.mubr.msk.f32.gmra.mxu1 %vm346_vm0, %v331_v21 }
  0x4f   : > { %3318 = vmatprep.mubr.msk.f32.mxu0 %vm346_vm0, %v316_v22  ;;  %3342 = vmatprep.mubr.msk.f32.mxu1 %vm346_vm0, %v332_v23 }
  0x52   : > { %3319 = vmatmul.mubr.msk.f32.gmra.mxu0 %vm346_vm0, %v317_v24  ;;  %3343 = vmatmul.mubr.msk.f32.gmra.mxu1 %vm346_vm0, %v333_v25 }
  0x53   : > { %3321 = vmatprep.mubr.msk.f32.mxu0 %vm346_vm0, %v318_v26  ;;  %3345 = vmatprep.mubr.msk.f32.mxu1 %vm346_vm0, %v334_v27 }
  0x56   : > { %3322 = vmatmul.mubr.msk.f32.gmra.mxu0 %vm346_vm0, %v319_v28  ;;  %3346 = vmatmul.mubr.msk.f32.gmra.mxu1 %vm346_vm0, %v335_v29 }
  0x57   : > { %3324 = vmatprep.mubr.msk.f32.mxu0 %vm346_vm0, %v320_v30  ;;  %3348 = vmatprep.mubr.msk.f32.mxu1 %vm346_vm0, %v336_v31 }
  0x5a   : > { %3325 = vmatmul.mubr.msk.f32.gmra.mxu0 %vm346_vm0, %v321_v32  ;;  %3349 = vmatmul.mubr.msk.f32.gmra.mxu1 %vm346_vm0, %v337_v33 }
  0xfe   : > { %v3305_v35 = vpop.f32.mrf.mxu0  ;;  %v3329_v36 = vpop.f32.mrf.mxu1 }
  0xff   : > { %v515_v37 = vadd.f32 %v3305_v35, %v3937_v34  ;;  %v595_v38 = vadd.f32 %v3329_v36, %v3937_v34 }
 0x100   : > { %v509_v39 = vpop.f32.mrf.mxu0  ;;  %v589_v40 = vpop.f32.mrf.mxu1 }
 0x101   : > { %v3941_v41 = vmax.f32 %v515_v37, 0.0  ;;  %v3943_v42 = vmax.f32 %v595_v38, 0.0  ;;  %v510_v43 = vadd.f32 %v3937_v34, %v509_v39  ;;  %v590_v44 = vadd.f32 %v3937_v34, %v589_v40 }
 0x102   : > { %v3308_v45 = vpop.f32.mrf.mxu0  ;;  %v3332_v54 = vpop.f32.mrf.mxu1 }
 0x103   : > { %944 = vrot.lane.b32.xlu1 %v3943_v42, %s3710_s21  ;;  %912 = vrot.lane.b32.xlu0 %v3941_v41, %s3710_s21  ;;  %v831_v46 = vrot.slane %v3941_v41, 1  ;;  %v3952_v48 = vmax.f32 %v510_v43, 0.0  ;;  %v3954_v49 = vmax.f32 %v590_v44, 0.0  ;;  %v855_v51 = vrot.slane %v3943_v42, 1 }
 0x104   : > { %v519_v47 = vpop.f32.mrf.mxu0  ;;  %v525_v53 = vadd.f32 %v3308_v45, %v3937_v34  ;;  %v605_v60 = vadd.f32 %v3332_v54, %v3937_v34  ;;  %v599_v63 = vpop.f32.mrf.mxu1  ;;  %v734_v44 = vrot.slane %v3941_v41, 7 }
 0x105   : > { %v894_v50 = vsel %vm829_vm1, %v831_v46, 0.0  ;;  %v854_v56 = vrot.slane %v3954_v49, 1  ;;  %v902_v57 = vsel %vm829_vm1, %v855_v51, 0.0  ;;  %v520_v62 = vadd.f32 %v3937_v34, %v519_v47 }
 0x106   : > { %v3311_v52 = vpop.f32.mrf.mxu0  ;;  %v3966_v59 = vmax.f32 %v525_v53, 0.0  ;;  %v3976_v2 = vmax.f32 %v605_v60, 0.0  ;;  %v600_v5 = vadd.f32 %v3937_v34, %v599_v63  ;;  %v830_v8 = vrot.slane %v3952_v48, 1  ;;  %v3335_v10 = vpop.f32.mrf.mxu1 }
 0x107   : > { %1024 = vrot.lane.b32.xlu1 %v894_v50, %s3711_s9  ;;  %910 = vrot.lane.b32.xlu0 %v3952_v48, %s3710_s21  ;;  %v856_v0 = vsel %vm829_vm1, %v854_v56, %v855_v51  ;;  %v3981_v4 = vmax.f32 %v520_v62, 0.0  ;;  %v535_v21 = vadd.f32 %v3311_v52, %v3937_v34 }
 0x108   : > { %v529_v55 = vpop.f32.mrf.mxu0  ;;  %v834_v13 = vrot.slane %v3966_v59, 1  ;;  %v3994_v14 = vmax.f32 %v600_v5, 0.0  ;;  %v832_v18 = vsel %vm829_vm1, %v830_v8, %v831_v46  ;;  %v609_v22 = vpop.f32.mrf.mxu1  ;;  %v858_v26 = vrot.slane %v3976_v2, 1 }
 0x109   : > { %v833_v17 = vrot.slane %v3981_v4, 1  ;;  %v530_v27 = vadd.f32 %v3937_v34, %v529_v55  ;;  %v4036_v50 = vmax.f32 %v535_v21, 0.0  ;;  %v615_v55 = vadd.f32 %v3335_v10, %v3937_v34 }
 0x10a   : > { %v3964_v58 = vpop.f32.mrf.mxu0  ;;  %v895_v31 = vsel %vm829_vm1, %v834_v13, 0.0  ;;  %v3338_v32 = vpop.f32.mrf.mxu1  ;;  %v857_v37 = vrot.slane %v3994_v14, 1  ;;  %v610_v5 = vadd.f32 %v3937_v34, %v609_v22  ;;  %v761_v22 = vrot.slane %v3976_v2, 7 }
 0x10b   : > { %1056 = vrot.lane.b32.xlu1 %v902_v57, %s3711_s9  ;;  %942 = vrot.lane.b32.xlu0 %v3954_v49, %s3710_s21  ;;  %v835_v38 = vsel %vm829_vm1, %v833_v17, %v834_v13  ;;  %v4038_v51 = vmax.f32 %v530_v27, 0.0  ;;  %v625_v10 = vadd.f32 %v3338_v32, %v3937_v34  ;;  %v757_v17 = vrot.slane %v3954_v49, 7 }
 0x10c   : > { %v3972_v61 = vpop.f32.mrf.mxu0  ;;  %v619_v56 = vpop.f32.mrf.mxu1  ;;  %v859_v63 = vsel %vm829_vm1, %v857_v37, %v858_v26  ;;  %v689_v21 = vmax.f32 %v615_v55, 0.0 }
 0x10d   : > { %v4095_v27 = vmax.f32 %v625_v10, 0.0 }
 0x10e   : > { %v3317_v1 = vpop.f32.mrf.mxu0  ;;  %v764_v37 = vrot.slane %v689_v21, 7 }
 0x10f   : > { %916 = vrot.lane.b32.xlu1 %v3966_v59, %s3710_s21  ;;  %1054 = vrot.lane.b32.xlu0 %v856_v0, %s3711_s9  ;;  %v555_v6 = vadd.f32 %v3317_v1, %v3937_v34  ;;  %v903_v0 = vsel %vm829_vm1, %v858_v26, 0.0  ;;  %v767_v55 = vrot.slane %v4095_v27, 7 }
 0x110   : > { %v549_v3 = vpop.f32.mrf.mxu0 }
 0x111   : > { %v550_v7 = vadd.f32 %v3937_v34, %v549_v3  ;;  %v3991_v11 = vmax.f32 %v555_v6, 0.0  ;;  %v545_v6 = vadd.f32 %v3964_v58, %v3937_v34 }
 0x112   : > { %v3320_v9 = vpop.f32.mrf.mxu0 }
 0x113   : > { %948 = vrot.lane.b32.xlu1 %v3976_v2, %s3710_s21  ;;  %914 = vrot.lane.b32.xlu0 %v3981_v4, %s3710_s21  ;;  %v3996_v15 = vmax.f32 %v550_v7, 0.0  ;;  %v565_v16 = vadd.f32 %v3320_v9, %v3937_v34  ;;  %v843_v19 = vrot.slane %v3991_v11, 1  ;;  %v540_v9 = vadd.f32 %v3937_v34, %v3972_v61 }
 0x114   : > { %v559_v12 = vpop.f32.mrf.mxu0  ;;  %v737_v61 = vrot.slane %v3966_v59, 7  ;;  %v4091_v59 = vmax.f32 %v545_v6, 0.0 }
 0x115   : > { %v842_v23 = vrot.slane %v3996_v15, 1  ;;  %v4007_v24 = vmax.f32 %v565_v16, 0.0  ;;  %v560_v25 = vadd.f32 %v3937_v34, %v559_v12  ;;  %v4013_v28 = vsel %vm829_vm1, %v843_v19, 0.0 }
 0x116   : > { %v3323_v20 = vpop.f32.mrf.mxu0  ;;  %v620_v12 = vadd.f32 %v3937_v34, %v619_v56  ;;  %v758_v16 = vrot.slane %v3943_v42, 7  ;;  %v4093_v26 = vmax.f32 %v540_v9, 0.0  ;;  %v745_v41 = vrot.slane %v3996_v15, 7 }
 0x117   : > { %946 = vrot.lane.b32.xlu0 %v3994_v14, %s3710_s21  ;;  %1022 = vrot.lane.b32.xlu1 %v832_v18, %s3711_s9  ;;  %v575_v29 = vadd.f32 %v3323_v20, %v3937_v34  ;;  %v846_v33 = vrot.slane %v4007_v24, 1  ;;  %v4018_v35 = vmax.f32 %v560_v25, 0.0  ;;  %v4021_v36 = vsel %vm829_vm1, %v842_v23, %v843_v19 }
 0x118   : > { %v569_v30 = vpop.f32.mrf.mxu0  ;;  %v733_v19 = vrot.slane %v3952_v48, 7  ;;  %v837_v20 = vrot.slane %v4036_v50, 1  ;;  %v836_v23 = vrot.slane %v4038_v51, 1  ;;  %v4082_v25 = vmax.f32 %v610_v5, 0.0 }
 0x119   : > { %v4025_v39 = vmax.f32 %v575_v29, 0.0  ;;  %v570_v40 = vadd.f32 %v3937_v34, %v569_v30  ;;  %v845_v45 = vrot.slane %v4018_v35, 1  ;;  %v4033_v46 = vsel %vm829_vm1, %v846_v33, 0.0 }
 0x11a   : > { %v3326_v43 = vpop.f32.mrf.mxu0  ;;  %v4097_v2 = vmax.f32 %v620_v12, 0.0  ;;  %v736_v29 = vrot.slane %v3981_v4, 7  ;;  %v760_v30 = vrot.slane %v3994_v14, 7  ;;  %v4105_v32 = vsel %vm732_vm2, %v757_v17, %v758_v16  ;;  %v1249_v16 = vld [vmem:[%s5084_s2] sm:$0xff] }
 0x11b   : > { %1026 = vrot.lane.b32.xlu0 %v835_v38, %s3711_s9  ;;  %1028 = vrot.lane.b32.xlu1 %v895_v31, %s3711_s9  ;;  %v585_v47 = vadd.f32 %v3326_v43, %v3937_v34  ;;  %v849_v52 = vrot.slane %v4025_v39, 1  ;;  %v4041_v53 = vmax.f32 %v570_v40, 0.0  ;;  %v4045_v57 = vsel %vm829_vm1, %v845_v45, %v846_v33 }
 0x11c   : > { %v579_v54 = vpop.f32.mrf.mxu0  ;;  %v740_v31 = vrot.slane %v4036_v50, 7  ;;  %v739_v33 = vrot.slane %v4038_v51, 7  ;;  %v861_v38 = vrot.slane %v689_v21, 1  ;;  %v896_v40 = vsel %vm829_vm1, %v837_v20, 0.0 }
 0x11d   : > { %v4047_v60 = vmax.f32 %v585_v47, 0.0  ;;  %v580_v62 = vadd.f32 %v3937_v34, %v579_v54  ;;  %v848_v1 = vrot.slane %v4041_v53, 1  ;;  %v4054_v3 = vsel %vm829_vm1, %v849_v52, 0.0 }
 0x11e   : > { %v763_v43 = vrot.slane %v4082_v25, 7  ;;  %v860_v45 = vrot.slane %v4082_v25, 1  ;;  %v838_v47 = vsel %vm829_vm1, %v836_v23, %v837_v20  ;;  %v742_v54 = vrot.slane %v4093_v26, 7 }
 0x11f   : > { %1058 = vrot.lane.b32.xlu0 %v859_v63, %s3711_s9  ;;  %1060 = vrot.lane.b32.xlu1 %v903_v0, %s3711_s9  ;;  %v852_v7 = vrot.slane %v4047_v60, 1  ;;  %v4062_v8 = vmax.f32 %v580_v62, 0.0  ;;  %v4069_v13 = vsel %vm829_vm1, %v848_v1, %v849_v52  ;;  %v743_v52 = vrot.slane %v4091_v59, 7  ;;  %v1250_v62 = vld [vmem:[%s5084_s2 + $0x8] sm:$0xf] }
 0x120   : > { %v766_v56 = vrot.slane %v4097_v2, 7  ;;  %v746_v63 = vrot.slane %v3991_v11, 7  ;;  %v749_v0 = vrot.slane %v4007_v24, 7  ;;  %v2986_v1 = vld [vmem:[%s5084_s2 + $0x18] sm:$0xf]  ;;  %v752_v5 = vrot.slane %v4025_v39, 7  ;;  %3403 = vmatprep.subr.msk.mxu0 %vm1382_vm4, %v1250_v62 }
 0x121   : > { %v851_v58 = vrot.slane %v4062_v8, 1  ;;  %v4075_v18 = vsel %vm829_vm1, %v852_v7, 0.0  ;;  %v751_v6 = vrot.slane %v4041_v53, 7  ;;  %v4146_v9 = vsel %vm732_vm2, %v760_v30, %v761_v22  ;;  %3351 = vmatprep.subr.msk.mxu1 %vm1382_vm4, %v2986_v1  ;;  %3404 = vmatpush3.msk.msra.mxu0 %vm1382_vm4, %v1250_v62 }
 0x122   : > { %v755_v10 = vrot.slane %v4047_v60, 7  ;;  %v754_v12 = vrot.slane %v4062_v8, 7  ;;  %v4167_v20 = vsel %vm732_vm2, %v739_v33, %v740_v31  ;;  %v862_v22 = vsel %vm829_vm1, %v860_v45, %v861_v38  ;;  %3352 = vmatpush3.msk.msra.mxu1 %vm1382_vm4, %v2986_v1  ;;  %3405 = vmatprep.subr.mxu0 %v1249_v16 }
 0x123   : > { %918 = vrot.lane.b32.xlu0 %v4038_v51, %s3710_s21  ;;  %920 = vrot.lane.b32.xlu1 %v4036_v50, %s3710_s21  ;;  %v4089_v42 = vsel %vm829_vm1, %v851_v58, %v852_v7  ;;  %v4120_v50 = vsel %vm732_vm2, %v733_v19, %v734_v44  ;;  %v748_v44 = vrot.slane %v4018_v35, 7  ;;  %v4141_v7 = vsel %vm732_vm2, %v736_v29, %v737_v61  ;;  %v2985_v58 = vld [vmem:[%s5084_s2 + $0x10] sm:$0xff] }
 0x124   : > { %v3712_v61 = vmov 0.0   ;;  %v904_v23 = vsel %vm829_vm1, %v861_v38, 0.0  ;;  %v4186_v31 = vsel %vm732_vm2, %v766_v56, %v767_v55  ;;  %3353 = vmatprep.subr.mxu1 %v2985_v58  ;;  %v4192_v38 = vsel %vm732_vm2, %v745_v41, %v746_v63  ;;  %3406 = vmatpush3.msra.mxu0 %v1249_v16 }
 0x125   : > { %301 = vst.msk [vmem:[#allocation2] sm:$0xff] %vm300_vm3, %v3712_v61  ;;  %302 = vst.msk [vmem:[#allocation2 + $0x8] sm:$0xff] %vm300_vm3, %v3712_v61  ;;  %v4195_v45 = vsel %vm732_vm2, 0.0, %v748_v44  ;;  %v4206_v55 = vsel %vm732_vm2, %v751_v6, %v752_v5  ;;  %v4209_v62 = vsel %vm732_vm2, 0.0, %v754_v12  ;;  %v4212_v63 = vsel %vm732_vm2, %v754_v12, %v755_v10  ;;  %3354 = vmatpush3.msra.mxu1 %v2985_v58  ;;  %v4237_v58 = vld [vmem:[%s5084_s2 + $0x28] sm:$0xf] }
 0x126   : > { %304 = vst.msk [vmem:[#allocation2 + $0x110] sm:$0xff] %vm300_vm3, %v3712_v61  ;;  %305 = vst.msk [vmem:[#allocation2 + $0x118] sm:$0xff] %vm300_vm3, %v3712_v61  ;;  %v839_v1 = vrot.slane %v4093_v26, 1  ;;  %v864_v5 = vrot.slane %v4095_v27, 1  ;;  %3455 = vmatprep.subr.msk.mxu1 %vm1382_vm4, %v4237_v58  ;;  %v822_v4 = vsel %vm732_vm2, 0.0, %v760_v30  ;;  %v3053_v30 = vld [vmem:[%s5084_s2 + $0x20] sm:$0xff] }
 0x127   : > { %950 = vrot.lane.b32.xlu0 %v4082_v25, %s3710_s21  ;;  %952 = vrot.lane.b32.xlu1 %v689_v21, %s3710_s21  ;;  %v4172_v21 = vsel %vm732_vm2, %v763_v43, %v764_v37  ;;  %v4189_v37 = vsel %vm732_vm2, 0.0, %v745_v41  ;;  %v823_v51 = vsel %vm732_vm2, 0.0, %v763_v43 }
 0x128   : > { %v905_v16 = vsel %vm829_vm1, %v864_v5, 0.0 }
 0x12b   : > { %1030 = vrot.lane.b32.xlu0 %v838_v47, %s3711_s9  ;;  %1032 = vrot.lane.b32.xlu1 %v896_v40, %s3711_s9  ;;  %v4181_v40 = vsel %vm732_vm2, %v742_v54, %v743_v52  ;;  %v4198_v47 = vsel %vm732_vm2, %v748_v44, %v749_v0  ;;  %v4203_v52 = vsel %vm732_vm2, 0.0, %v751_v6  ;;  %v840_v44 = vrot.slane %v4091_v59, 1 }
 0x12c   : > { %v1217_v41 = vld [vmem:[#allocation2] sm:$0xff]  ;;  %v1218_v0 = vld [vmem:[#allocation2 + $0x8] sm:$0xff]  ;;  %v863_v6 = vrot.slane %v4097_v2, 1 }
 0x12d   : > { %3407 = vmatprep.mubr.msk.f32.mxu0 %vm300_vm3, %v1217_v41  ;;  %v841_v10 = vsel %vm829_vm1, %v839_v1, %v840_v44  ;;  %v897_v12 = vsel %vm829_vm1, %v840_v44, 0.0 }
 0x12e   : > { %3408 = vmatmul.mubr.msk.f32.vlgmr.msra.gmra.mxu0 %vm300_vm3, %v1218_v0 }
 0x12f   : > { %1062 = vrot.lane.b32.xlu0 %v862_v22, %s3711_s9  ;;  %1064 = vrot.lane.b32.xlu1 %v904_v23, %s3711_s9 }
 0x133   : > { %922 = vrot.lane.b32.xlu0 %v4093_v26, %s3710_s21  ;;  %924 = vrot.lane.b32.xlu1 %v4091_v59, %s3710_s21  ;;  %v865_v59 = vsel %vm829_vm1, %v863_v6, %v864_v5  ;;  %v824_v26 = vsel %vm732_vm2, 0.0, %v766_v56 }
 0x137   : > { %954 = vrot.lane.b32.xlu0 %v4097_v2, %s3710_s21  ;;  %956 = vrot.lane.b32.xlu1 %v4095_v27, %s3710_s21 }
 0x13b   : > { %1034 = vrot.lane.b32.xlu0 %v841_v10, %s3711_s9  ;;  %1036 = vrot.lane.b32.xlu1 %v897_v12, %s3711_s9 }
 0x13f   : > { %1066 = vrot.lane.b32.xlu0 %v865_v59, %s3711_s9  ;;  %1068 = vrot.lane.b32.xlu1 %v905_v16, %s3711_s9 }
 0x143   : > { %926 = vrot.lane.b32.xlu0 %v3996_v15, %s3710_s21  ;;  %928 = vrot.lane.b32.xlu1 %v3991_v11, %s3710_s21  ;;  %v3341_v11 = vpop.f32.mrf.mxu1 }
 0x145   : > { %v629_v15 = vpop.f32.mrf.mxu1 }
 0x147   : > { %1038 = vrot.lane.b32.xlu0 %v4021_v36, %s3711_s9  ;;  %1040 = vrot.lane.b32.xlu1 %v4013_v28, %s3711_s9  ;;  %v630_v28 = vadd.f32 %v3937_v34, %v629_v15 }
 0x14b   : > { %930 = vrot.lane.b32.xlu0 %v4018_v35, %s3710_s21  ;;  %932 = vrot.lane.b32.xlu1 %v4007_v24, %s3710_s21  ;;  %v635_v24 = vadd.f32 %v3341_v11, %v3937_v34  ;;  %v3344_v35 = vpop.f32.mrf.mxu1 }
 0x14d   : > { %v4273_v36 = vmax.f32 %v635_v24, 0.0 }
 0x14f   : > { %1042 = vrot.lane.b32.xlu0 %v4045_v57, %s3711_s9  ;;  %1044 = vrot.lane.b32.xlu1 %v4033_v46, %s3711_s9  ;;  %v639_v46 = vpop.f32.mrf.mxu1 }
 0x153   : > { %934 = vrot.lane.b32.xlu0 %v4041_v53, %s3710_s21  ;;  %936 = vrot.lane.b32.xlu1 %v4025_v39, %s3710_s21  ;;  %v4275_v39 = vmax.f32 %v630_v28, 0.0  ;;  %v867_v53 = vrot.slane %v4273_v36, 1 }
 0x155   : > { %v866_v57 = vrot.slane %v4275_v39, 1  ;;  %v906_v27 = vsel %vm829_vm1, %v867_v53, 0.0 }
 0x157   : > { %1046 = vrot.lane.b32.xlu0 %v4069_v13, %s3711_s9  ;;  %1048 = vrot.lane.b32.xlu1 %v4054_v3, %s3711_s9  ;;  %v645_v3 = vadd.f32 %v3344_v35, %v3937_v34 }
 0x159   : > { %v4289_v13 = vmax.f32 %v645_v3, 0.0 }
 0x15b   : > { %938 = vrot.lane.b32.xlu0 %v4062_v8, %s3710_s21  ;;  %940 = vrot.lane.b32.xlu1 %v4047_v60, %s3710_s21  ;;  %v640_v60 = vadd.f32 %v3937_v34, %v639_v46  ;;  %v3347_v8 = vpop.f32.mrf.mxu1  ;;  %v870_v22 = vrot.slane %v4289_v13, 1 }
 0x15c   : > { %v655_v41 = vadd.f32 %v3347_v8, %v3937_v34 }
 0x15d   : > { %v649_v61 = vpop.f32.mrf.mxu1  ;;  %v907_v10 = vsel %vm829_vm1, %v870_v22, 0.0 }
 0x15e   : > { %v650_v0 = vadd.f32 %v3937_v34, %v649_v61  ;;  %v4305_v1 = vmax.f32 %v655_v41, 0.0 }
 0x15f   : > { %1050 = vrot.lane.b32.xlu0 %v4089_v42, %s3711_s9  ;;  %1052 = vrot.lane.b32.xlu1 %v4075_v18, %s3711_s9  ;;  %v4291_v42 = vmax.f32 %v640_v60, 0.0  ;;  %v868_v18 = vsel %vm829_vm1, %v866_v57, %v867_v53  ;;  %v3350_v44 = vpop.f32.mrf.mxu1 }
 0x160   : > { %v4307_v5 = vmax.f32 %v650_v0, 0.0  ;;  %v873_v59 = vrot.slane %v4305_v1, 1  ;;  %v665_v11 = vadd.f32 %v3350_v44, %v3937_v34  ;;  %v821_v44 = vsel %vm732_vm2, 0.0, %v757_v17 }
 0x161   : > { %v869_v23 = vrot.slane %v4291_v42, 1  ;;  %v659_v12 = vpop.f32.mrf.mxu1 }
 0x162   : > { %v872_v16 = vrot.slane %v4307_v5, 1  ;;  %v660_v15 = vadd.f32 %v3937_v34, %v659_v12  ;;  %v4321_v35 = vmax.f32 %v665_v11, 0.0  ;;  %v908_v57 = vsel %vm829_vm1, %v873_v59, 0.0 }
 0x163   : > { %958 = vrot.lane.b32.xlu0 %v4275_v39, %s3710_s21  ;;  %960 = vrot.lane.b32.xlu1 %v4273_v36, %s3710_s21  ;;  %v871_v6 = vsel %vm829_vm1, %v869_v23, %v870_v22  ;;  %v813_v11 = vsel %vm732_vm2, 0.0, %v733_v19 }
 0x164   : > { %v4323_v46 = vmax.f32 %v660_v15, 0.0  ;;  %v874_v53 = vsel %vm829_vm1, %v872_v16, %v873_v59  ;;  %v876_v8 = vrot.slane %v4321_v35, 1 }
 0x166   : > { %v909_v0 = vsel %vm829_vm1, %v876_v8, 0.0 }
 0x167   : > { %1070 = vrot.lane.b32.xlu0 %v868_v18, %s3711_s9  ;;  %1072 = vrot.lane.b32.xlu1 %v906_v27, %s3711_s9  ;;  %v875_v18 = vrot.slane %v4323_v46, 1 }
 0x169   : > { %v877_v41 = vsel %vm829_vm1, %v875_v18, %v876_v8 }
 0x16b   : > { %962 = vrot.lane.b32.xlu0 %v4291_v42, %s3710_s21  ;;  %964 = vrot.lane.b32.xlu1 %v4289_v13, %s3710_s21 }
 0x16f   : > { %1074 = vrot.lane.b32.xlu0 %v871_v6, %s3711_s9  ;;  %1076 = vrot.lane.b32.xlu1 %v907_v10, %s3711_s9 }
 0x173   : > { %966 = vrot.lane.b32.xlu0 %v4307_v5, %s3710_s21  ;;  %968 = vrot.lane.b32.xlu1 %v4305_v1, %s3710_s21 }
 0x175   : > { %v945_v24 = vpop.permute.xlu1 %944  ;;  %v913_v28 = vpop.permute.xlu0 %912 }
 0x176   : > { %v1120_v34 = vsel %vm1118_vm5, %v4120_v50, %v913_v28  ;;  %v1136_v61 = vsel %vm1118_vm5, %v4105_v32, %v945_v24  ;;  %v814_v28 = vsel %vm732_vm2, 0.0, %v736_v29 }
 0x177   : > { %1078 = vrot.lane.b32.xlu0 %v874_v53, %s3711_s9  ;;  %1080 = vrot.lane.b32.xlu1 %v908_v57, %s3711_s9 }
 0x179   : > { %v1025_v3 = vpop.permute.xlu1 %1024  ;;  %v911_v60 = vpop.permute.xlu0 %910 }
 0x17a   : > { %v1153_v27 = vsel %vm1151_vm6, %v1120_v34, %v1025_v3  ;;  %v1119_v15 = vsel %vm1118_vm5, %v813_v11, %v911_v60 }
 0x17b   : > { %1186 = vst.msk [vmem:[#allocation2 + $0x18] sm:$0xff] %vm300_vm3, %v1153_v27  ;;  %970 = vrot.lane.b32.xlu0 %v4323_v46, %s3710_s21  ;;  %972 = vrot.lane.b32.xlu1 %v4321_v35, %s3710_s21 }
 0x17d   : > { %v1057_v50 = vpop.permute.xlu1 %1056  ;;  %v943_v22 = vpop.permute.xlu0 %942 }
 0x17e   : > { %v1169_v23 = vsel %vm1151_vm6, %v1136_v61, %v1057_v50  ;;  %v1135_v32 = vsel %vm1118_vm5, %v821_v44, %v943_v22 }
 0x17f   : > { %1202 = vst.msk [vmem:[#allocation2 + $0x98] sm:$0xff] %vm300_vm3, %v1169_v23  ;;  %1082 = vrot.lane.b32.xlu0 %v877_v41, %s3711_s9  ;;  %1084 = vrot.lane.b32.xlu1 %v909_v0, %s3711_s9 }
 0x181   : > { %v917_v6 = vpop.permute.xlu1 %916  ;;  %v1055_v10 = vpop.permute.xlu0 %1054 }
 0x182   : > { %v1168_v12 = vsel %vm1151_vm6, %v1135_v32, %v1055_v10  ;;  %v1122_v53 = vsel %vm1118_vm5, %v4141_v7, %v917_v6  ;;  %v1252_v14 = vld [vmem:[#allocation2 + $0x18] sm:$0xff] }
 0x183   : > { %1201 = vst.msk [vmem:[#allocation2 + $0x90] sm:$0xff] %vm300_vm3, %v1168_v12 }
 0x185   : > { %v949_v59 = vpop.permute.xlu1 %948  ;;  %v915_v16 = vpop.permute.xlu0 %914 }
 0x186   : > { %v1121_v57 = vsel %vm1118_vm5, %v814_v28, %v915_v16  ;;  %v1138_v29 = vsel %vm1118_vm5, %v4146_v9, %v949_v59 }
 0x189   : > { %v947_v24 = vpop.permute.xlu0 %946  ;;  %v1023_v49 = vpop.permute.xlu1 %1022 }
 0x18a   : > { %v1152_v17 = vsel %vm1151_vm6, %v1119_v15, %v1023_v49  ;;  %v1137_v7 = vsel %vm1118_vm5, %v822_v4, %v947_v24 }
 0x18b   : > { %1185 = vst.msk [vmem:[#allocation2 + $0x10] sm:$0xff] %vm300_vm3, %v1152_v17 }
 0x18d   : > { %v1027_v48 = vpop.permute.xlu0 %1026  ;;  %v1029_v34 = vpop.permute.xlu1 %1028 }
 0x18e   : > { %v1154_v19 = vsel %vm1151_vm6, %v1121_v57, %v1027_v48  ;;  %v1155_v3 = vsel %vm1151_vm6, %v1122_v53, %v1029_v34  ;;  %v816_v53 = vsel %vm732_vm2, 0.0, %v742_v54 }
 0x18f   : > { %1187 = vst.msk [vmem:[#allocation2 + $0x20] sm:$0xff] %vm300_vm3, %v1154_v19  ;;  %1188 = vst.msk [vmem:[#allocation2 + $0x28] sm:$0xff] %vm300_vm3, %v1155_v3 }
 0x191   : > { %v1059_v60 = vpop.permute.xlu0 %1058  ;;  %v1061_v8 = vpop.permute.xlu1 %1060 }
 0x192   : > { %v1170_v18 = vsel %vm1151_vm6, %v1137_v7, %v1059_v60  ;;  %v1171_v27 = vsel %vm1151_vm6, %v1138_v29, %v1061_v8  ;;  %v1251_v61 = vld [vmem:[#allocation2 + $0x10] sm:$0xff] }
 0x193   : > { %1203 = vst.msk [vmem:[#allocation2 + $0xa0] sm:$0xff] %vm300_vm3, %v1170_v18  ;;  %1204 = vst.msk [vmem:[#allocation2 + $0xa8] sm:$0xff] %vm300_vm3, %v1171_v27  ;;  %3355 = vmatprep.mubr.msk.f32.mxu1 %vm300_vm3, %v1251_v61  ;;  %3410 = vmatprep.mubr.msk.f32.mxu0 %vm300_vm3, %v1251_v61 }
 0x194   : > { %3356 = vmatmul.mubr.msk.f32.vlgmr.msra.gmra.mxu1 %vm300_vm3, %v1252_v14  ;;  %3411 = vmatmul.mubr.msk.f32.gmra.mxu0 %vm300_vm3, %v1252_v14 }
 0x195   : > { %v919_v9 = vpop.permute.xlu0 %918  ;;  %v921_v50 = vpop.permute.xlu1 %920  ;;  %3456 = vmatpush3.msk.msra.mxu1 %vm1382_vm4, %v4237_v58  ;;  %v815_v58 = vsel %vm732_vm2, 0.0, %v739_v33 }
 0x196   : > { %v4388_v22 = vld [vmem:[#allocation2 + $0x20] sm:$0xff]  ;;  %v4390_v23 = vld [vmem:[#allocation2 + $0x28] sm:$0xff]  ;;  %3457 = vmatprep.subr.mxu1 %v3053_v30  ;;  %v1123_v44 = vsel %vm1118_vm5, %v815_v58, %v919_v9  ;;  %v1124_v32 = vsel %vm1118_vm5, %v4167_v20, %v921_v50 }
 0x197   : > { %3358 = vmatprep.mubr.msk.f32.mxu1 %vm300_vm3, %v4388_v22  ;;  %3413 = vmatprep.mubr.msk.f32.mxu0 %vm300_vm3, %v4388_v22 }
 0x198   : > { %3359 = vmatmul.mubr.msk.f32.gmra.mxu1 %vm300_vm3, %v4390_v23  ;;  %3414 = vmatmul.mubr.msk.f32.gmra.mxu0 %vm300_vm3, %v4390_v23 }
 0x199   : > { %v951_v41 = vpop.permute.xlu0 %950  ;;  %v953_v0 = vpop.permute.xlu1 %952  ;;  %3458 = vmatpush3.msra.mxu1 %v3053_v30 }
 0x19a   : > { %v1139_v33 = vsel %vm1118_vm5, %v823_v51, %v951_v41  ;;  %v1140_v16 = vsel %vm1118_vm5, %v4172_v21, %v953_v0 }
 0x19d   : > { %v1031_v6 = vpop.permute.xlu0 %1030  ;;  %v1033_v10 = vpop.permute.xlu1 %1032 }
 0x19e   : > { %v1156_v12 = vsel %vm1151_vm6, %v1123_v44, %v1031_v6  ;;  %v1157_v59 = vsel %vm1151_vm6, %v1124_v32, %v1033_v10 }
 0x19f   : > { %1189 = vst.msk [vmem:[#allocation2 + $0x30] sm:$0xff] %vm300_vm3, %v1156_v12  ;;  %1190 = vst.msk [vmem:[#allocation2 + $0x38] sm:$0xff] %vm300_vm3, %v1157_v59 }
 0x1a1   : > { %v1063_v20 = vpop.permute.xlu0 %1062  ;;  %v1065_v11 = vpop.permute.xlu1 %1064 }
 0x1a2   : > { %v1172_v15 = vsel %vm1151_vm6, %v1139_v33, %v1063_v20  ;;  %v1173_v24 = vsel %vm1151_vm6, %v1140_v16, %v1065_v11 }
 0x1a3   : > { %1205 = vst.msk [vmem:[#allocation2 + $0xb0] sm:$0xff] %vm300_vm3, %v1172_v15  ;;  %1206 = vst.msk [vmem:[#allocation2 + $0xb8] sm:$0xff] %vm300_vm3, %v1173_v24 }
 0x1a5   : > { %v923_v49 = vpop.permute.xlu0 %922  ;;  %v925_v17 = vpop.permute.xlu1 %924 }
 0x1a6   : > { %v4420_v25 = vld [vmem:[#allocation2 + $0x30] sm:$0xff]  ;;  %v4422_v43 = vld [vmem:[#allocation2 + $0x38] sm:$0xff]  ;;  %v1125_v57 = vsel %vm1118_vm5, %v816_v53, %v923_v49  ;;  %v1126_v48 = vsel %vm1118_vm5, %v4181_v40, %v925_v17 }
 0x1a7   : > { %3361 = vmatprep.mubr.msk.f32.mxu1 %vm300_vm3, %v4420_v25  ;;  %3416 = vmatprep.mubr.msk.f32.mxu0 %vm300_vm3, %v4420_v25 }
 0x1a8   : > { %3362 = vmatmul.mubr.msk.f32.gmra.mxu1 %vm300_vm3, %v4422_v43  ;;  %3417 = vmatmul.mubr.msk.f32.gmra.mxu0 %vm300_vm3, %v4422_v43 }
 0x1a9   : > { %v955_v21 = vpop.permute.xlu0 %954  ;;  %v957_v28 = vpop.permute.xlu1 %956 }
 0x1aa   : > { %v1141_v54 = vsel %vm1118_vm5, %v824_v26, %v955_v21  ;;  %v1142_v29 = vsel %vm1118_vm5, %v4186_v31, %v957_v28 }
 0x1ad   : > { %v1035_v34 = vpop.permute.xlu0 %1034  ;;  %v1037_v19 = vpop.permute.xlu1 %1036 }
 0x1ae   : > { %v1158_v3 = vsel %vm1151_vm6, %v1125_v57, %v1035_v34  ;;  %v1159_v4 = vsel %vm1151_vm6, %v1126_v48, %v1037_v19 }
 0x1af   : > { %1191 = vst.msk [vmem:[#allocation2 + $0x40] sm:$0xff] %vm300_vm3, %v1158_v3  ;;  %1192 = vst.msk [vmem:[#allocation2 + $0x48] sm:$0xff] %vm300_vm3, %v1159_v4 }
 0x1b1   : > { %v1067_v40 = vpop.permute.xlu0 %1066  ;;  %v1069_v7 = vpop.permute.xlu1 %1068 }
 0x1b2   : > { %v1174_v60 = vsel %vm1151_vm6, %v1141_v54, %v1067_v40  ;;  %v1175_v8 = vsel %vm1151_vm6, %v1142_v29, %v1069_v7 }
 0x1b3   : > { %1207 = vst.msk [vmem:[#allocation2 + $0xc0] sm:$0xff] %vm300_vm3, %v1174_v60  ;;  %1208 = vst.msk [vmem:[#allocation2 + $0xc8] sm:$0xff] %vm300_vm3, %v1175_v8 }
 0x1b5   : > { %v927_v18 = vpop.permute.xlu0 %926  ;;  %v929_v27 = vpop.permute.xlu1 %928 }
 0x1b6   : > { %v4452_v2 = vld [vmem:[#allocation2 + $0x40] sm:$0xff]  ;;  %v4454_v56 = vld [vmem:[#allocation2 + $0x48] sm:$0xff]  ;;  %v1127_v31 = vsel %vm1118_vm5, %v4189_v37, %v927_v18  ;;  %v1128_v61 = vsel %vm1118_vm5, %v4192_v38, %v929_v27  ;;  %v773_v18 = vrot.slane %v4289_v13, 7  ;;  %v772_v27 = vrot.slane %v4291_v42, 7 }
 0x1b7   : > { %3364 = vmatprep.mubr.msk.f32.mxu1 %vm300_vm3, %v4452_v2  ;;  %3419 = vmatprep.mubr.msk.f32.mxu0 %vm300_vm3, %v4452_v2 }
 0x1b8   : > { %3365 = vmatmul.mubr.msk.f32.gmra.mxu1 %vm300_vm3, %v4454_v56  ;;  %3420 = vmatmul.mubr.msk.f32.gmra.mxu0 %vm300_vm3, %v4454_v56  ;;  %v826_v13 = vsel %vm732_vm2, 0.0, %v772_v27  ;;  %v774_v42 = vsel %vm732_vm2, %v772_v27, %v773_v18 }
 0x1b9   : > { %v1039_v14 = vpop.permute.xlu0 %1038  ;;  %v1041_v30 = vpop.permute.xlu1 %1040 }
 0x1ba   : > { %v1160_v9 = vsel %vm1151_vm6, %v1127_v31, %v1039_v14  ;;  %v1161_v50 = vsel %vm1151_vm6, %v1128_v61, %v1041_v30  ;;  %v4556_v31 = vld [vmem:[#allocation2 + $0x90] sm:$0xff]  ;;  %v4562_v30 = vld [vmem:[#allocation2 + $0x98] sm:$0xff] }
 0x1bb   : > { %1193 = vst.msk [vmem:[#allocation2 + $0x50] sm:$0xff] %vm300_vm3, %v1160_v9  ;;  %1194 = vst.msk [vmem:[#allocation2 + $0x58] sm:$0xff] %vm300_vm3, %v1161_v50  ;;  %v4570_v9 = vld [vmem:[#allocation2 + $0xa0] sm:$0xff] }
 0x1bd   : > { %v931_v41 = vpop.permute.xlu0 %930  ;;  %v933_v0 = vpop.permute.xlu1 %932 }
 0x1be   : > { %v1129_v58 = vsel %vm1118_vm5, %v4195_v45, %v931_v41  ;;  %v1130_v37 = vsel %vm1118_vm5, %v4198_v47, %v933_v0 }
 0x1c1   : > { %v1043_v44 = vpop.permute.xlu0 %1042  ;;  %v1045_v38 = vpop.permute.xlu1 %1044 }
 0x1c2   : > { %v1162_v32 = vsel %vm1151_vm6, %v1129_v58, %v1043_v44  ;;  %v1163_v6 = vsel %vm1151_vm6, %v1130_v37, %v1045_v38  ;;  %v4478_v10 = vld [vmem:[#allocation2 + $0x50] sm:$0xff]  ;;  %v4480_v12 = vld [vmem:[#allocation2 + $0x58] sm:$0xff]  ;;  %v4582_v38 = vld [vmem:[#allocation2 + $0xa8] sm:$0xff] }
 0x1c3   : > { %1195 = vst.msk [vmem:[#allocation2 + $0x60] sm:$0xff] %vm300_vm3, %v1162_v32  ;;  %1196 = vst.msk [vmem:[#allocation2 + $0x68] sm:$0xff] %vm300_vm3, %v1163_v6  ;;  %3367 = vmatprep.mubr.msk.f32.mxu1 %vm300_vm3, %v4478_v10  ;;  %3422 = vmatprep.mubr.msk.f32.mxu0 %vm300_vm3, %v4478_v10  ;;  %v776_v32 = vrot.slane %v4305_v1, 7  ;;  %v775_v6 = vrot.slane %v4307_v5, 7 }
 0x1c4   : > { %3368 = vmatmul.mubr.msk.f32.gmra.mxu1 %vm300_vm3, %v4480_v12  ;;  %3423 = vmatmul.mubr.msk.f32.gmra.mxu0 %vm300_vm3, %v4480_v12 }
 0x1c5   : > { %v935_v45 = vpop.permute.xlu0 %934  ;;  %v937_v47 = vpop.permute.xlu1 %936  ;;  %v827_v1 = vsel %vm732_vm2, 0.0, %v775_v6  ;;  %v777_v5 = vsel %vm732_vm2, %v775_v6, %v776_v32 }
 0x1c6   : > { %v1131_v59 = vsel %vm1118_vm5, %v4203_v52, %v935_v45  ;;  %v1132_v51 = vsel %vm1118_vm5, %v4206_v55, %v937_v47  ;;  %v4590_v45 = vld [vmem:[#allocation2 + $0xb0] sm:$0xff] }
 0x1c9   : > { %v1047_v33 = vpop.permute.xlu0 %1046  ;;  %v1049_v16 = vpop.permute.xlu1 %1048 }
 0x1ca   : > { %v1164_v20 = vsel %vm1151_vm6, %v1131_v59, %v1047_v33  ;;  %v1165_v11 = vsel %vm1151_vm6, %v1132_v51, %v1049_v16  ;;  %v4498_v15 = vld [vmem:[#allocation2 + $0x60] sm:$0xff]  ;;  %v4500_v24 = vld [vmem:[#allocation2 + $0x68] sm:$0xff]  ;;  %v4596_v51 = vld [vmem:[#allocation2 + $0xb8] sm:$0xff] }
 0x1cb   : > { %1197 = vst.msk [vmem:[#allocation2 + $0x70] sm:$0xff] %vm300_vm3, %v1164_v20  ;;  %1198 = vst.msk [vmem:[#allocation2 + $0x78] sm:$0xff] %vm300_vm3, %v1165_v11  ;;  %3370 = vmatprep.mubr.msk.f32.mxu1 %vm300_vm3, %v4498_v15  ;;  %3425 = vmatprep.mubr.msk.f32.mxu0 %vm300_vm3, %v4498_v15  ;;  %v4604_v33 = vld [vmem:[#allocation2 + $0xc0] sm:$0xff] }
 0x1cc   : > { %3371 = vmatmul.mubr.msk.f32.gmra.mxu1 %vm300_vm3, %v4500_v24  ;;  %3426 = vmatmul.mubr.msk.f32.gmra.mxu0 %vm300_vm3, %v4500_v24 }
 0x1cd   : > { %v939_v52 = vpop.permute.xlu0 %938  ;;  %v941_v55 = vpop.permute.xlu1 %940 }
 0x1ce   : > { %v1133_v49 = vsel %vm1118_vm5, %v4209_v62, %v939_v52  ;;  %v1134_v17 = vsel %vm1118_vm5, %v4212_v63, %v941_v55  ;;  %v770_v62 = vrot.slane %v4273_v36, 7  ;;  %v769_v63 = vrot.slane %v4275_v39, 7 }
 0x1d0   : > { %v825_v4 = vsel %vm732_vm2, 0.0, %v769_v63  ;;  %v771_v26 = vsel %vm732_vm2, %v769_v63, %v770_v62 }
 0x1d1   : > { %v1051_v21 = vpop.permute.xlu0 %1050  ;;  %v1053_v28 = vpop.permute.xlu1 %1052 }
 0x1d2   : > { %v1166_v53 = vsel %vm1151_vm6, %v1133_v49, %v1051_v21  ;;  %v1167_v57 = vsel %vm1151_vm6, %v1134_v17, %v1053_v28  ;;  %v4518_v48 = vld [vmem:[#allocation2 + $0x70] sm:$0xff]  ;;  %v4520_v34 = vld [vmem:[#allocation2 + $0x78] sm:$0xff]  ;;  %v4616_v17 = vld [vmem:[#allocation2 + $0xc8] sm:$0xff]  ;;  %v779_v21 = vrot.slane %v4321_v35, 7  ;;  %v778_v28 = vrot.slane %v4323_v46, 7 }
 0x1d3   : > { %1199 = vst.msk [vmem:[#allocation2 + $0x80] sm:$0xff] %vm300_vm3, %v1166_v53  ;;  %1200 = vst.msk [vmem:[#allocation2 + $0x88] sm:$0xff] %vm300_vm3, %v1167_v57  ;;  %3373 = vmatprep.mubr.msk.f32.mxu1 %vm300_vm3, %v4518_v48  ;;  %3428 = vmatprep.mubr.msk.f32.mxu0 %vm300_vm3, %v4518_v48 }
 0x1d4   : > { %3374 = vmatmul.mubr.msk.f32.gmra.mxu1 %vm300_vm3, %v4520_v34  ;;  %3429 = vmatmul.mubr.msk.f32.gmra.mxu0 %vm300_vm3, %v4520_v34  ;;  %v780_v35 = vsel %vm732_vm2, %v778_v28, %v779_v21 }
 0x1d5   : > { %v959_v19 = vpop.permute.xlu0 %958  ;;  %v961_v3 = vpop.permute.xlu1 %960 }
 0x1d6   : > { %v1143_v54 = vsel %vm1118_vm5, %v825_v4, %v959_v19  ;;  %v1144_v29 = vsel %vm1118_vm5, %v771_v26, %v961_v3  ;;  %v828_v19 = vsel %vm732_vm2, 0.0, %v778_v28 }
 0x1d9   : > { %v1071_v40 = vpop.permute.xlu0 %1070  ;;  %v1073_v36 = vpop.permute.xlu1 %1072 }
 0x1da   : > { %v1176_v39 = vsel %vm1151_vm6, %v1143_v54, %v1071_v40  ;;  %v1177_v7 = vsel %vm1151_vm6, %v1144_v29, %v1073_v36  ;;  %v4540_v60 = vld [vmem:[#allocation2 + $0x80] sm:$0xff]  ;;  %v4542_v8 = vld [vmem:[#allocation2 + $0x88] sm:$0xff] }
 0x1db   : > { %1209 = vst.msk [vmem:[#allocation2 + $0xd0] sm:$0xff] %vm300_vm3, %v1176_v39  ;;  %1210 = vst.msk [vmem:[#allocation2 + $0xd8] sm:$0xff] %vm300_vm3, %v1177_v7  ;;  %3376 = vmatprep.mubr.msk.f32.mxu1 %vm300_vm3, %v4540_v60  ;;  %3431 = vmatprep.mubr.msk.f32.mxu0 %vm300_vm3, %v4540_v60 }
 0x1dc   : > { %3377 = vmatmul.mubr.msk.f32.gmra.mxu1 %vm300_vm3, %v4542_v8  ;;  %3432 = vmatmul.mubr.msk.f32.gmra.mxu0 %vm300_vm3, %v4542_v8 }
 0x1dd   : > { %v963_v61 = vpop.permute.xlu0 %962  ;;  %v965_v14 = vpop.permute.xlu1 %964  ;;  %3379 = vmatprep.mubr.msk.f32.mxu1 %vm300_vm3, %v4556_v31  ;;  %3434 = vmatprep.mubr.msk.f32.mxu0 %vm300_vm3, %v4556_v31 }
 0x1de   : > { %v1145_v50 = vsel %vm1118_vm5, %v826_v13, %v963_v61  ;;  %v1146_v41 = vsel %vm1118_vm5, %v774_v42, %v965_v14  ;;  %v2397_v61 = vld [vmem:[%s5085_s3] sm:$0xf] }
 0x1df   : > { %3507 = vmatprep.subr.msk.mxu0 %vm1382_vm4, %v2397_v61 }
 0x1e0   : > { %3380 = vmatmul.mubr.msk.f32.gmra.mxu1 %vm300_vm3, %v4562_v30  ;;  %3435 = vmatmul.mubr.msk.f32.gmra.mxu0 %vm300_vm3, %v4562_v30 }
 0x1e1   : > { %v1075_v0 = vpop.permute.xlu0 %1074  ;;  %v1077_v58 = vpop.permute.xlu1 %1076  ;;  %3382 = vmatprep.mubr.msk.f32.mxu1 %vm300_vm3, %v4570_v9  ;;  %3437 = vmatprep.mubr.msk.f32.mxu0 %vm300_vm3, %v4570_v9 }
 0x1e2   : > { %v1178_v37 = vsel %vm1151_vm6, %v1145_v50, %v1075_v0  ;;  %v1179_v44 = vsel %vm1151_vm6, %v1146_v41, %v1077_v58  ;;  %v1275_v53 = vld [vmem:[#allocation2 + $0xd0] sm:$0xff]  ;;  %v1276_v63 = vld [vmem:[#allocation2 + $0xd8] sm:$0xff]  ;;  %3508 = vmatpush3.msk.msra.mxu0 %vm1382_vm4, %v2397_v61 }
 0x1e3   : > { %1211 = vst.msk [vmem:[#allocation2 + $0xe0] sm:$0xff] %vm300_vm3, %v1178_v37  ;;  %1212 = vst.msk [vmem:[#allocation2 + $0xe8] sm:$0xff] %vm300_vm3, %v1179_v44 }
 0x1e4   : > { %3383 = vmatmul.mubr.msk.f32.gmra.mxu1 %vm300_vm3, %v4582_v38  ;;  %3438 = vmatmul.mubr.msk.f32.gmra.mxu0 %vm300_vm3, %v4582_v38 }
 0x1e5   : > { %v967_v47 = vpop.permute.xlu0 %966  ;;  %v969_v59 = vpop.permute.xlu1 %968  ;;  %3385 = vmatprep.mubr.msk.f32.mxu1 %vm300_vm3, %v4590_v45  ;;  %3440 = vmatprep.mubr.msk.f32.mxu0 %vm300_vm3, %v4590_v45 }
 0x1e6   : > { %v1147_v16 = vsel %vm1118_vm5, %v827_v1, %v967_v47  ;;  %v1148_v20 = vsel %vm1118_vm5, %v777_v5, %v969_v59 }
 0x1e8   : > { %3386 = vmatmul.mubr.msk.f32.gmra.mxu1 %vm300_vm3, %v4596_v51  ;;  %3441 = vmatmul.mubr.msk.f32.gmra.mxu0 %vm300_vm3, %v4596_v51 }
 0x1e9   : > { %v1079_v11 = vpop.permute.xlu0 %1078  ;;  %v1081_v52 = vpop.permute.xlu1 %1080  ;;  %3388 = vmatprep.mubr.msk.f32.mxu1 %vm300_vm3, %v4604_v33  ;;  %3443 = vmatprep.mubr.msk.f32.mxu0 %vm300_vm3, %v4604_v33 }
 0x1ea   : > { %v1180_v55 = vsel %vm1151_vm6, %v1147_v16, %v1079_v11  ;;  %v1181_v49 = vsel %vm1151_vm6, %v1148_v20, %v1081_v52  ;;  %v1277_v46 = vld [vmem:[#allocation2 + $0xe0] sm:$0xff]  ;;  %v1278_v36 = vld [vmem:[#allocation2 + $0xe8] sm:$0xff] }
 0x1eb   : > { %1213 = vst.msk [vmem:[#allocation2 + $0xf0] sm:$0xff] %vm300_vm3, %v1180_v55  ;;  %1214 = vst.msk [vmem:[#allocation2 + $0xf8] sm:$0xff] %vm300_vm3, %v1181_v49 }
 0x1ec   : > { %3389 = vmatmul.mubr.msk.f32.gmra.mxu1 %vm300_vm3, %v4616_v17  ;;  %3444 = vmatmul.mubr.msk.f32.gmra.mxu0 %vm300_vm3, %v4616_v17 }
 0x1ed   : > { %v971_v57 = vpop.permute.xlu0 %970  ;;  %v973_v62 = vpop.permute.xlu1 %972  ;;  %3391 = vmatprep.mubr.msk.f32.mxu1 %vm300_vm3, %v1275_v53  ;;  %3446 = vmatprep.mubr.msk.f32.mxu0 %vm300_vm3, %v1275_v53 }
 0x1ee   : > { %v1149_v3 = vsel %vm1118_vm5, %v828_v19, %v971_v57  ;;  %v1150_v4 = vsel %vm1118_vm5, %v780_v35, %v973_v62 }
 0x1f0   : > { %3392 = vmatmul.mubr.msk.f32.gmra.mxu1 %vm300_vm3, %v1276_v63  ;;  %3447 = vmatmul.mubr.msk.f32.gmra.mxu0 %vm300_vm3, %v1276_v63 }
 0x1f1   : > { %v1083_v26 = vpop.permute.xlu0 %1082  ;;  %v1085_v54 = vpop.permute.xlu1 %1084  ;;  %3394 = vmatprep.mubr.msk.f32.mxu1 %vm300_vm3, %v1277_v46  ;;  %3449 = vmatprep.mubr.msk.f32.mxu0 %vm300_vm3, %v1277_v46 }
 0x1f2   : > { %v1182_v29 = vsel %vm1151_vm6, %v1149_v3, %v1083_v26  ;;  %v1183_v40 = vsel %vm1151_vm6, %v1150_v4, %v1085_v54  ;;  %v1279_v39 = vld [vmem:[#allocation2 + $0xf0] sm:$0xff]  ;;  %v1280_v7 = vld [vmem:[#allocation2 + $0xf8] sm:$0xff]  ;;  %v4778_v26 = vld [vmem:[%s5087_s5] ss:$0 sm:$0xff] }
 0x1f3   : > { %1215 = vst.msk [vmem:[#allocation2 + $0x100] sm:$0xff] %vm300_vm3, %v1182_v29  ;;  %1216 = vst.msk [vmem:[#allocation2 + $0x108] sm:$0xff] %vm300_vm3, %v1183_v40 }
 0x1f4   : > { %3395 = vmatmul.mubr.msk.f32.gmra.mxu1 %vm300_vm3, %v1278_v36  ;;  %3450 = vmatmul.mubr.msk.f32.gmra.mxu0 %vm300_vm3, %v1278_v36 }
 0x1f5   : > { %3397 = vmatprep.mubr.msk.f32.mxu1 %vm300_vm3, %v1279_v39  ;;  %3452 = vmatprep.mubr.msk.f32.mxu0 %vm300_vm3, %v1279_v39 }
 0x1f8   : > { %3398 = vmatmul.mubr.msk.f32.gmra.mxu1 %vm300_vm3, %v1280_v7  ;;  %3453 = vmatmul.mubr.msk.f32.gmra.mxu0 %vm300_vm3, %v1280_v7 }
 0x1fa   : > { %v1281_v18 = vld [vmem:[#allocation2 + $0x100] sm:$0xff]  ;;  %v1282_v27 = vld [vmem:[#allocation2 + $0x108] sm:$0xff] }
 0x1fb   : > { %3400 = vmatprep.mubr.msk.f32.mxu1 %vm300_vm3, %v1281_v18 }
 0x1fc   : > { %3401 = vmatmul.mubr.msk.f32.gmra.mxu1 %vm300_vm3, %v1282_v27 }
 0x1fd   : > { %3459 = vmatprep.mubr.msk.f32.mxu1 %vm300_vm3, %v4388_v22  ;;  %v1966_v22 = vld [vmem:[#allocation2 + $0x110] sm:$0xff] }
 0x200   : > { %3460 = vmatmul.mubr.msk.f32.vlgmr.msra.gmra.mxu1 %vm300_vm3, %v4390_v23  ;;  %v1967_v23 = vld [vmem:[#allocation2 + $0x118] sm:$0xff] }
 0x201   : > { %3462 = vmatprep.mubr.msk.f32.mxu1 %vm300_vm3, %v4420_v25 }
 0x204   : > { %3463 = vmatmul.mubr.msk.f32.gmra.mxu1 %vm300_vm3, %v4422_v43 }
 0x205   : > { %3465 = vmatprep.mubr.msk.f32.mxu1 %vm300_vm3, %v4452_v2 }
 0x208   : > { %3466 = vmatmul.mubr.msk.f32.gmra.mxu1 %vm300_vm3, %v4454_v56 }
 0x209   : > { %3468 = vmatprep.mubr.msk.f32.mxu1 %vm300_vm3, %v4478_v10 }
 0x20c   : > { %3469 = vmatmul.mubr.msk.f32.gmra.mxu1 %vm300_vm3, %v4480_v12 }
 0x20d   : > { %3471 = vmatprep.mubr.msk.f32.mxu1 %vm300_vm3, %v4498_v15 }
 0x210   : > { %3472 = vmatmul.mubr.msk.f32.gmra.mxu1 %vm300_vm3, %v4500_v24 }
 0x211   : > { %3474 = vmatprep.mubr.msk.f32.mxu1 %vm300_vm3, %v4518_v48 }
 0x214   : > { %3475 = vmatmul.mubr.msk.f32.gmra.mxu1 %vm300_vm3, %v4520_v34  ;;  %v3409_v34 = vpop.f32.mrf.mxu0 }
 0x215   : > { %3477 = vmatprep.mubr.msk.f32.mxu1 %vm300_vm3, %v4540_v60 }
 0x218   : > { %3478 = vmatmul.mubr.msk.f32.gmra.mxu1 %vm300_vm3, %v4542_v8  ;;  %v1776_v8 = vpop.f32.mrf.mxu0 }
 0x219   : > { %3480 = vmatprep.mubr.msk.f32.mxu1 %vm300_vm3, %v4556_v31 }
 0x21c   : > { %3481 = vmatmul.mubr.msk.f32.gmra.mxu1 %vm300_vm3, %v4562_v30 }
 0x21d   : > { %3483 = vmatprep.mubr.msk.f32.mxu1 %vm300_vm3, %v4570_v9 }
 0x220   : > { %3484 = vmatmul.mubr.msk.f32.gmra.mxu1 %vm300_vm3, %v4582_v38 }
 0x221   : > { %3486 = vmatprep.mubr.msk.f32.mxu1 %vm300_vm3, %v4590_v45 }
 0x224   : > { %3487 = vmatmul.mubr.msk.f32.gmra.mxu1 %vm300_vm3, %v4596_v51 }
 0x225   : > { %3489 = vmatprep.mubr.msk.f32.mxu1 %vm300_vm3, %v4604_v33 }
 0x228   : > { %3490 = vmatmul.mubr.msk.f32.gmra.mxu1 %vm300_vm3, %v4616_v17 }
 0x229   : > { %3492 = vmatprep.mubr.msk.f32.mxu1 %vm300_vm3, %v1275_v53 }
 0x22c   : > { %3493 = vmatmul.mubr.msk.f32.gmra.mxu1 %vm300_vm3, %v1276_v63 }
 0x22d   : > { %3495 = vmatprep.mubr.msk.f32.mxu1 %vm300_vm3, %v1277_v46 }
 0x230   : > { %3496 = vmatmul.mubr.msk.f32.gmra.mxu1 %vm300_vm3, %v1278_v36 }
 0x231   : > { %3498 = vmatprep.mubr.msk.f32.mxu1 %vm300_vm3, %v1279_v39 }
 0x234   : > { %3499 = vmatmul.mubr.msk.f32.gmra.mxu1 %vm300_vm3, %v1280_v7 }
 0x235   : > { %3501 = vmatprep.mubr.msk.f32.mxu1 %vm300_vm3, %v1281_v18 }
 0x238   : > { %3502 = vmatmul.mubr.msk.f32.gmra.mxu1 %vm300_vm3, %v1282_v27 }
 0x239   : > { %3504 = vmatprep.mubr.msk.f32.mxu1 %vm300_vm3, %v1966_v22 }
 0x23c   : > { %3505 = vmatmul.mubr.msk.f32.gmra.mxu1 %vm300_vm3, %v1967_v23 }
 0x254   : > { %v3357_v25 = vpop.f32.mrf.mxu1  ;;  %v3412_v14 = vpop.f32.mrf.mxu0 }
 0x255   : > { %v1782_v35 = vadd.f32 %v3409_v34, %v3357_v25 }
 0x256   : > { %v1452_v43 = vpop.f32.mrf.mxu1  ;;  %v1786_v42 = vpop.f32.mrf.mxu0 }
 0x257   : > { %v1777_v4 = vadd.f32 %v1776_v8, %v1452_v43 }
 0x258   : > { %v3360_v2 = vpop.f32.mrf.mxu1  ;;  %v3415_v50 = vpop.f32.mrf.mxu0 }
 0x259   : > { %v1792_v40 = vadd.f32 %v3412_v14, %v3360_v2 }
 0x25a   : > { %v1462_v56 = vpop.f32.mrf.mxu1  ;;  %v1796_v58 = vpop.f32.mrf.mxu0 }
 0x25b   : > { %v1787_v27 = vadd.f32 %v1786_v42, %v1462_v56 }
 0x268   : > { %v3363_v10 = vpop.f32.mrf.mxu1  ;;  %v3418_v44 = vpop.f32.mrf.mxu0 }
 0x269   : > { %v1802_v25 = vadd.f32 %v3415_v50, %v3363_v10 }
 0x26a   : > { %v4705_v12 = vpop.f32.mrf.mxu1  ;;  %v1806_v6 = vpop.f32.mrf.mxu0 }
 0x26b   : > { %v1797_v14 = vadd.f32 %v1796_v58, %v4705_v12 }
 0x278   : > { %v4707_v15 = vpop.f32.mrf.mxu1  ;;  %v3421_v47 = vpop.f32.mrf.mxu0 }
 0x279   : > { %v1812_v10 = vadd.f32 %v3418_v44, %v4707_v15 }
 0x27a   : > { %v4709_v24 = vpop.f32.mrf.mxu1  ;;  %v4739_v1 = vpop.f32.mrf.mxu0 }
 0x27b   : > { %v1807_v12 = vadd.f32 %v1806_v6, %v4709_v24 }
 0x284   : > { %v4711_v48 = vpop.f32.mrf.mxu1  ;;  %v4743_v33 = vpop.f32.mrf.mxu0 }
 0x285   : > { %v1822_v15 = vadd.f32 %v3421_v47, %v4711_v48 }
 0x286   : > { %v4713_v60 = vpop.f32.mrf.mxu1  ;;  %v4749_v11 = vpop.f32.mrf.mxu0 }
 0x287   : > { %v1817_v24 = vadd.f32 %v4739_v1, %v4713_v60 }
 0x28c   : > { %v4715_v31 = vpop.f32.mrf.mxu1  ;;  %v4753_v55 = vpop.f32.mrf.mxu0 }
 0x28d   : > { %v1832_v48 = vadd.f32 %v4743_v33, %v4715_v31 }
 0x28e   : > { %v4717_v30 = vpop.f32.mrf.mxu1  ;;  %v4759_v21 = vpop.f32.mrf.mxu0 }
 0x28f   : > { %v1827_v60 = vadd.f32 %v4749_v11, %v4717_v30 }
 0x294   : > { %v4719_v13 = vpop.f32.mrf.mxu1  ;;  %v4763_v53 = vpop.f32.mrf.mxu0 }
 0x295   : > { %v1842_v31 = vadd.f32 %v4753_v55, %v4719_v13 }
 0x296   : > { %v4721_v9 = vpop.f32.mrf.mxu1  ;;  %v4769_v63 = vpop.f32.mrf.mxu0 }
 0x297   : > { %v1837_v30 = vadd.f32 %v4759_v21, %v4721_v9 }
 0x29c   : > { %v4723_v41 = vpop.f32.mrf.mxu1  ;;  %v4773_v46 = vpop.f32.mrf.mxu0 }
 0x29d   : > { %v1852_v13 = vadd.f32 %v4763_v53, %v4723_v41 }
 0x29e   : > { %v4725_v0 = vpop.f32.mrf.mxu1  ;;  %v4780_v39 = vpop.f32.mrf.mxu0 }
 0x29f   : > { %v1847_v9 = vadd.f32 %v4769_v63, %v4725_v0 }
 0x2a0   : > { %v4727_v37 = vpop.f32.mrf.mxu1  ;;  %v4784_v8 = vpop.f32.mrf.mxu0 }
 0x2a1   : > { %v1862_v41 = vadd.f32 %v4773_v46, %v4727_v37 }
 0x2a2   : > { %v4729_v38 = vpop.f32.mrf.mxu1 }
 0x2a3   : > { %v1857_v0 = vadd.f32 %v4780_v39, %v4729_v38 }
 0x2a4   : > { %v4731_v32 = vpop.f32.mrf.mxu1 }
 0x2a5   : > { %v1872_v37 = vadd.f32 %v4784_v8, %v4731_v32 }
 0x2a6   : > { %v4733_v45 = vpop.f32.mrf.mxu1 }
 0x2a8   : > { %v4735_v59 = vpop.f32.mrf.mxu1 }
 0x2aa   : > { %v4737_v51 = vpop.f32.mrf.mxu1 }
 0x2ac   : > { %v4741_v5 = vpop.f32.mrf.mxu1 }
 0x2ae   : > { %v4745_v16 = vpop.f32.mrf.mxu1 }
 0x2b0   : > { %v4747_v20 = vpop.f32.mrf.mxu1 }
 0x2b2   : > { %v4751_v52 = vpop.f32.mrf.mxu1 }
 0x2b4   : > { %v4755_v49 = vpop.f32.mrf.mxu1 }
 0x2b6   : > { %v4757_v17 = vpop.f32.mrf.mxu1 }
 0x2b8   : > { %v4761_v28 = vpop.f32.mrf.mxu1 }
 0x2ba   : > { %v4765_v57 = vpop.f32.mrf.mxu1 }
 0x2bc   : > { %v4767_v62 = vpop.f32.mrf.mxu1 }
 0x2be   : > { %v4771_v19 = vpop.f32.mrf.mxu1 }
 0x2bf   : > { %5098 = vst [vmem:[#allocation9_spill] sm:$0xff] %v4771_v19 }
 0x2c0   : > { %v3461_v3 = vpop.f32.mrf.mxu1 }
 0x2c1   : > { %v2296_v54 = vadd.f32 %v3461_v3, %v1782_v35 }
 0x2c2   : > { %v2136_v29 = vpop.f32.mrf.mxu1 }
 0x2c3   : > { %v2295_v36 = vadd.f32 %v2136_v29, %v1777_v4  ;;  %v2334_v7 = vadd.f32 %v4778_v26, %v2296_v54  ;;  %v4792_v54 = vpop.f32.mrf.mxu0 }
 0x2c4   : > { %v3464_v18 = vpop.f32.mrf.mxu1  ;;  %v1867_v38 = vadd.f32 %v4792_v54, %v4733_v45 }
 0x2c5   : > { %v2333_v61 = vadd.f32 %v4778_v26, %v2295_v36  ;;  %v2298_v22 = vadd.f32 %v3464_v18, %v1792_v40  ;;  %v2366_v19 = vmax.f32 %v2334_v7, 0.0 }
 0x2c6   : > { %v2146_v23 = vpop.f32.mrf.mxu1 }
 0x2c7   : > { %v2365_v43 = vmax.f32 %v2333_v61, 0.0  ;;  %v2297_v34 = vadd.f32 %v2146_v23, %v1787_v27  ;;  %v2336_v35 = vadd.f32 %v4778_v26, %v2298_v22  ;;  %v4800_v27 = vpop.f32.mrf.mxu0 }
 0x2c8   : > { %v3467_v2 = vpop.f32.mrf.mxu1  ;;  %v1882_v32 = vadd.f32 %v4800_v27, %v4735_v59 }
 0x2c9   : > { %v2335_v3 = vadd.f32 %v4778_v26, %v2297_v34  ;;  %v2300_v4 = vadd.f32 %v3467_v2, %v1802_v25  ;;  %3509 = vmatprep.mubr.msk.f32.mxu0 %vm1118_vm5, %v2365_v43  ;;  %v2368_v29 = vmax.f32 %v2336_v35, 0.0  ;;  %v4810_v35 = vpop.f32.mrf.mxu0 }
 0x2ca   : > { %v2156_v56 = vpop.f32.mrf.mxu1  ;;  %3510 = vmatmul.mubr.msk.f32.vlgmr.msra.gmra.mxu0 %vm1118_vm5, %v2366_v19  ;;  %v1877_v45 = vadd.f32 %v4810_v35, %v4737_v51 }
 0x2cb   : > { %v2367_v42 = vmax.f32 %v2335_v3, 0.0  ;;  %v2299_v50 = vadd.f32 %v2156_v56, %v1797_v14  ;;  %v2338_v40 = vadd.f32 %v4778_v26, %v2300_v4 }
 0x2cc   : > { %v3470_v36 = vpop.f32.mrf.mxu1 }
 0x2cd   : > { %v2337_v58 = vadd.f32 %v4778_v26, %v2299_v50  ;;  %v2302_v7 = vadd.f32 %v3470_v36, %v1812_v10  ;;  %3512 = vmatprep.mubr.msk.f32.mxu0 %vm1118_vm5, %v2367_v42  ;;  %v2370_v61 = vmax.f32 %v2338_v40, 0.0  ;;  %v3442_v42 = vpop.f32.mrf.mxu0 }
 0x2ce   : > { %v2166_v18 = vpop.f32.mrf.mxu1  ;;  %3513 = vmatmul.mubr.msk.f32.gmra.mxu0 %vm1118_vm5, %v2368_v29  ;;  %v1892_v59 = vadd.f32 %v3442_v42, %v4741_v5 }
 0x2cf   : > { %v2369_v44 = vmax.f32 %v2337_v58, 0.0  ;;  %v2301_v19 = vadd.f32 %v2166_v18, %v1807_v12  ;;  %v2340_v22 = vadd.f32 %v4778_v26, %v2302_v7  ;;  %v1886_v7 = vpop.f32.mrf.mxu0 }
 0x2d0   : > { %v3473_v23 = vpop.f32.mrf.mxu1 }
 0x2d1   : > { %v2339_v6 = vadd.f32 %v4778_v26, %v2301_v19  ;;  %v2304_v25 = vadd.f32 %v3473_v23, %v1822_v15  ;;  %3515 = vmatprep.mubr.msk.f32.mxu0 %vm1118_vm5, %v2369_v44  ;;  %v2372_v2 = vmax.f32 %v2340_v22, 0.0  ;;  %v3445_v23 = vpop.f32.mrf.mxu0 }
 0x2d2   : > { %v2176_v43 = vpop.f32.mrf.mxu1  ;;  %3516 = vmatmul.mubr.msk.f32.gmra.mxu0 %vm1118_vm5, %v2370_v61 }
 0x2d3   : > { %v2371_v47 = vmax.f32 %v2339_v6, 0.0  ;;  %v2303_v34 = vadd.f32 %v2176_v43, %v1817_v24  ;;  %v2342_v14 = vadd.f32 %v4778_v26, %v2304_v25 }
 0x2d4   : > { %v3476_v3 = vpop.f32.mrf.mxu1 }
 0x2d5   : > { %v2341_v1 = vadd.f32 %v4778_v26, %v2303_v34  ;;  %v2306_v4 = vadd.f32 %v3476_v3, %v1832_v48  ;;  %3518 = vmatprep.mubr.msk.f32.mxu0 %vm1118_vm5, %v2371_v47  ;;  %v2374_v50 = vmax.f32 %v2342_v14, 0.0  ;;  %v1896_v34 = vpop.f32.mrf.mxu0 }
 0x2d6   : > { %v2186_v56 = vpop.f32.mrf.mxu1  ;;  %3519 = vmatmul.mubr.msk.f32.gmra.mxu0 %vm1118_vm5, %v2372_v2 }
 0x2d7   : > { %v2373_v33 = vmax.f32 %v2341_v1, 0.0  ;;  %v2305_v10 = vadd.f32 %v2186_v56, %v1827_v60  ;;  %v2344_v29 = vadd.f32 %v4778_v26, %v2306_v4  ;;  %v3448_v56 = vpop.f32.mrf.mxu0 }
 0x2d8   : > { %v3479_v40 = vpop.f32.mrf.mxu1 }
 0x2d9   : > { %v2343_v11 = vadd.f32 %v4778_v26, %v2305_v10  ;;  %v2308_v36 = vadd.f32 %v3479_v40, %v1842_v31  ;;  %3521 = vmatprep.mubr.msk.f32.mxu0 %vm1118_vm5, %v2373_v33  ;;  %v2376_v18 = vmax.f32 %v2344_v29, 0.0 }
 0x2da   : > { %v2196_v12 = vpop.f32.mrf.mxu1  ;;  %3522 = vmatmul.mubr.msk.f32.gmra.mxu0 %vm1118_vm5, %v2374_v50 }
 0x2db   : > { %v2375_v55 = vmax.f32 %v2343_v11, 0.0  ;;  %v2307_v58 = vadd.f32 %v2196_v12, %v1837_v30  ;;  %v2346_v15 = vadd.f32 %v4778_v26, %v2308_v36  ;;  %v1906_v30 = vpop.f32.mrf.mxu0 }
 0x2dc   : > { %v3482_v44 = vpop.f32.mrf.mxu1 }
 0x2dd   : > { %v2345_v21 = vadd.f32 %v4778_v26, %v2307_v58  ;;  %v2310_v19 = vadd.f32 %v3482_v44, %v1852_v13  ;;  %3524 = vmatprep.mubr.msk.f32.mxu0 %vm1118_vm5, %v2375_v55  ;;  %v2378_v24 = vmax.f32 %v2346_v15, 0.0  ;;  %v1887_v13 = vadd.f32 %v1886_v7, %v4745_v16 }
 0x2de   : > { %v2206_v61 = vpop.f32.mrf.mxu1  ;;  %3525 = vmatmul.mubr.msk.f32.gmra.mxu0 %vm1118_vm5, %v2376_v18  ;;  %v1902_v58 = vadd.f32 %v3445_v23, %v4747_v20  ;;  %v3451_v18 = vpop.f32.mrf.mxu0 }
 0x2df   : > { %v2377_v53 = vmax.f32 %v2345_v21, 0.0  ;;  %v2309_v22 = vadd.f32 %v2206_v61, %v1847_v9  ;;  %v2348_v6 = vadd.f32 %v4778_v26, %v2310_v19  ;;  %v1897_v21 = vadd.f32 %v1896_v34, %v4751_v52 }
 0x2e0   : > { %v3485_v25 = vpop.f32.mrf.mxu1  ;;  %v1912_v61 = vadd.f32 %v3448_v56, %v4755_v49 }
 0x2e1   : > { %v2347_v63 = vadd.f32 %v4778_v26, %v2309_v22  ;;  %v2312_v43 = vadd.f32 %v3485_v25, %v1862_v41  ;;  %3527 = vmatprep.mubr.msk.f32.mxu0 %vm1118_vm5, %v2377_v53  ;;  %v2380_v2 = vmax.f32 %v2348_v6, 0.0  ;;  %v1916_v53 = vpop.f32.mrf.mxu0  ;;  %v1907_v6 = vadd.f32 %v1906_v30, %v4757_v17  ;;  %v2398_v30 = vld [vmem:[%s3858_s15] sm:$0xff] }
 0x2e2   : > { %v2216_v48 = vpop.f32.mrf.mxu1  ;;  %3528 = vmatmul.mubr.msk.f32.gmra.mxu0 %vm1118_vm5, %v2378_v24  ;;  %v1917_v34 = vadd.f32 %v1916_v53, %v4765_v57 }
 0x2e3   : > { %v2379_v46 = vmax.f32 %v2347_v63, 0.0  ;;  %v2311_v47 = vadd.f32 %v2216_v48, %v1857_v0  ;;  %v2350_v14 = vadd.f32 %v4778_v26, %v2312_v43  ;;  %v1922_v63 = vadd.f32 %v3451_v18, %v4761_v28  ;;  %v3454_v48 = vpop.f32.mrf.mxu0 }
 0x2e4   : > { %v3488_v3 = vpop.f32.mrf.mxu1 }
 0x2e5   : > { %v2349_v39 = vadd.f32 %v4778_v26, %v2311_v47  ;;  %v2314_v60 = vadd.f32 %v3488_v3, %v1872_v37  ;;  %3530 = vmatprep.mubr.msk.f32.mxu0 %vm1118_vm5, %v2379_v46  ;;  %v2382_v31 = vmax.f32 %v2350_v14, 0.0  ;;  %v1932_v3 = vadd.f32 %v3454_v48, %v4767_v62 }
 0x2e6   : > { %v2226_v1 = vpop.f32.mrf.mxu1  ;;  %3531 = vmatmul.mubr.msk.f32.gmra.mxu0 %vm1118_vm5, %v2380_v2 }
 0x2e7   : > { %v2381_v8 = vmax.f32 %v2349_v39, 0.0  ;;  %v2313_v4 = vadd.f32 %v2226_v1, %v1867_v38  ;;  %v2352_v33 = vadd.f32 %v4778_v26, %v2314_v60  ;;  %v1926_v39 = vpop.f32.mrf.mxu0 }
 0x2e8   : > { %v3491_v10 = vpop.f32.mrf.mxu1 }
 0x2e9   : > { %v2351_v54 = vadd.f32 %v4778_v26, %v2313_v4  ;;  %v2316_v50 = vadd.f32 %v3491_v10, %v1882_v32  ;;  %3533 = vmatprep.mubr.msk.f32.mxu0 %vm1118_vm5, %v2381_v8  ;;  %v2384_v11 = vmax.f32 %v2352_v33, 0.0  ;;  %v5099_v8 = vld [vmem:[#allocation9_spill] sm:$0xff] }
 0x2ea   : > { %v2236_v29 = vpop.f32.mrf.mxu1  ;;  %3534 = vmatmul.mubr.msk.f32.gmra.mxu0 %vm1118_vm5, %v2382_v31  ;;  %v1927_v4 = vadd.f32 %v1926_v39, %v5099_v8  ;;  %v2409_v39 = vld [vmem:[%s3858_s15 + $0x58] sm:$0xff] }
 0x2eb   : > { %v2383_v27 = vmax.f32 %v2351_v54, 0.0  ;;  %v2315_v40 = vadd.f32 %v2236_v29, %v1877_v45  ;;  %v2354_v36 = vadd.f32 %v4778_v26, %v2316_v50 }
 0x2ec   : > { %v3494_v12 = vpop.f32.mrf.mxu1 }
 0x2ed   : > { %v2353_v51 = vadd.f32 %v4778_v26, %v2315_v40  ;;  %v2318_v35 = vadd.f32 %v3494_v12, %v1892_v59  ;;  %3536 = vmatprep.mubr.msk.f32.mxu0 %vm1118_vm5, %v2383_v27  ;;  %v2386_v15 = vmax.f32 %v2354_v36, 0.0  ;;  %v4897_v59 = vld [vmem:[%s5088_s6] ss:$0 sm:$0xff]  ;;  %v2399_v27 = vld [vmem:[%s3858_s15 + $0x8] sm:$0xff] }
 0x2ee   : > { %v2246_v55 = vpop.f32.mrf.mxu1  ;;  %3537 = vmatmul.mubr.msk.f32.gmra.mxu0 %vm1118_vm5, %v2384_v11 }
 0x2ef   : > { %v2385_v5 = vmax.f32 %v2353_v51, 0.0  ;;  %v2317_v42 = vadd.f32 %v2246_v55, %v1887_v13  ;;  %v2356_v44 = vadd.f32 %v4778_v26, %v2318_v35  ;;  %v2401_v13 = vld [vmem:[%s3858_s15 + $0x18] sm:$0xff] }
 0x2f0   : > { %v3497_v9 = vpop.f32.mrf.mxu1 }
 0x2f1   : > { %v2355_v16 = vadd.f32 %v4778_v26, %v2317_v42  ;;  %v2320_v7 = vadd.f32 %v3497_v9, %v1902_v58  ;;  %3539 = vmatprep.mubr.msk.f32.mxu0 %vm1118_vm5, %v2385_v5  ;;  %v2388_v22 = vmax.f32 %v2356_v44, 0.0  ;;  %v2400_v5 = vld [vmem:[%s3858_s15 + $0x10] sm:$0xff]  ;;  %v2403_v9 = vld [vmem:[%s3858_s15 + $0x28] sm:$0xff] }
 0x2f2   : > { %v2256_v19 = vpop.f32.mrf.mxu1  ;;  %3540 = vmatmul.mubr.msk.f32.gmra.mxu0 %vm1118_vm5, %v2386_v15 }
 0x2f3   : > { %v2387_v20 = vmax.f32 %v2355_v16, 0.0  ;;  %v2319_v41 = vadd.f32 %v2256_v19, %v1897_v21  ;;  %v2358_v23 = vadd.f32 %v4778_v26, %v2320_v7 }
 0x2f4   : > { %v3500_v24 = vpop.f32.mrf.mxu1 }
 0x2f5   : > { %v2357_v52 = vadd.f32 %v4778_v26, %v2319_v41  ;;  %v2322_v25 = vadd.f32 %v3500_v24, %v1912_v61  ;;  %3542 = vmatprep.mubr.msk.f32.mxu0 %vm1118_vm5, %v2387_v20  ;;  %v2390_v37 = vmax.f32 %v2358_v23, 0.0  ;;  %v2402_v61 = vld [vmem:[%s3858_s15 + $0x20] sm:$0xff]  ;;  %v2405_v23 = vld [vmem:[%s3858_s15 + $0x38] sm:$0xff] }
 0x2f6   : > { %v2266_v0 = vpop.f32.mrf.mxu1  ;;  %3543 = vmatmul.mubr.msk.f32.gmra.mxu0 %vm1118_vm5, %v2388_v22 }
 0x2f7   : > { %v2389_v49 = vmax.f32 %v2357_v52, 0.0  ;;  %v2321_v43 = vadd.f32 %v2266_v0, %v1907_v6  ;;  %v2360_v46 = vadd.f32 %v4778_v26, %v2322_v25  ;;  %v2404_v0 = vld [vmem:[%s3858_s15 + $0x30] sm:$0xff] }
 0x2f8   : > { %v3503_v47 = vpop.f32.mrf.mxu1 }
 0x2f9   : > { %v2359_v17 = vadd.f32 %v4778_v26, %v2321_v43  ;;  %v2324_v2 = vadd.f32 %v3503_v47, %v1922_v63  ;;  %3545 = vmatprep.mubr.msk.f32.mxu0 %vm1118_vm5, %v2389_v49  ;;  %v2392_v60 = vmax.f32 %v2360_v46, 0.0 }
 0x2fa   : > { %v2276_v14 = vpop.f32.mrf.mxu1  ;;  %3546 = vmatmul.mubr.msk.f32.gmra.mxu0 %vm1118_vm5, %v2390_v37  ;;  %v2407_v37 = vld [vmem:[%s3858_s15 + $0x48] sm:$0xff] }
 0x2fb   : > { %v2391_v28 = vmax.f32 %v2359_v17, 0.0  ;;  %v2323_v38 = vadd.f32 %v2276_v14, %v1917_v34  ;;  %v2362_v1 = vadd.f32 %v4778_v26, %v2324_v2  ;;  %v2406_v2 = vld [vmem:[%s3858_s15 + $0x40] sm:$0xff] }
 0x2fc   : > { %v3506_v32 = vpop.f32.mrf.mxu1 }
 0x2fd   : > { %v2361_v57 = vadd.f32 %v4778_v26, %v2323_v38  ;;  %v2326_v56 = vadd.f32 %v3506_v32, %v1932_v3  ;;  %3548 = vmatprep.mubr.msk.f32.mxu0 %vm1118_vm5, %v2391_v28  ;;  %v2394_v10 = vmax.f32 %v2362_v1, 0.0 }
 0x2fe   : > { %v2286_v31 = vpop.f32.mrf.mxu1  ;;  %3549 = vmatmul.mubr.msk.f32.gmra.mxu0 %vm1118_vm5, %v2392_v60 }
 0x2ff   : > { %v2393_v62 = vmax.f32 %v2361_v57, 0.0  ;;  %v2325_v33 = vadd.f32 %v2286_v31, %v1927_v4  ;;  %v2364_v45 = vadd.f32 %v4778_v26, %v2326_v56  ;;  %v2408_v4 = vld [vmem:[%s3858_s15 + $0x50] sm:$0xff] }
 0x301   : > { %v2363_v54 = vadd.f32 %v4778_v26, %v2325_v33  ;;  %3551 = vmatprep.mubr.msk.f32.mxu0 %vm1118_vm5, %v2393_v62  ;;  %v2396_v29 = vmax.f32 %v2364_v45, 0.0  ;;  %v2411_v33 = vld [vmem:[%s3858_s15 + $0x68] sm:$0xff] }
 0x302   : > { %3552 = vmatmul.mubr.msk.f32.gmra.mxu0 %vm1118_vm5, %v2394_v10 }
 0x303   : > { %v2395_v50 = vmax.f32 %v2363_v54, 0.0 }
 0x305   : > { %3554 = vmatprep.mubr.msk.f32.mxu0 %vm1118_vm5, %v2395_v50 }
 0x306   : > { %3555 = vmatmul.mubr.msk.f32.gmra.mxu0 %vm1118_vm5, %v2396_v29  ;;  %v2410_v29 = vld [vmem:[%s3858_s15 + $0x60] sm:$0xff] }
 0x38a   : > { %v3511_v40 = vpop.f32.mrf.mxu0 }
 0x38b   : > { %v2607_v26 = vadd.f32 %v3511_v40, %v4897_v59 }
 0x38c   : > { %v2601_v11 = vpop.f32.mrf.mxu0 }
 0x38d   : > { %v2761_v36 = vadd.f32 %v2607_v26, %v2399_v27  ;;  %v2602_v12 = vadd.f32 %v4897_v59, %v2601_v11  ;;  %v2413_v11 = vld [vmem:[%s3858_s15 + $0x78] sm:$0xff] }
 0x38e   : > { %v3514_v51 = vpop.f32.mrf.mxu0 }
 0x38f   : > { %v2793_v35 = vmax.f32 %v2761_v36, 0.0  ;;  %v2760_v55 = vadd.f32 %v2602_v12, %v2398_v30  ;;  %v2617_v58 = vadd.f32 %v3514_v51, %v4897_v59 }
 0x390   : > { %v2611_v42 = vpop.f32.mrf.mxu0 }
 0x391   : > { %2825 = vst.msk [vmem:[%s4908_s19 + $0x8] sm:$0xff] %vm346_vm0, %v2793_v35  ;;  %v2792_v18 = vmax.f32 %v2760_v55, 0.0  ;;  %v2763_v15 = vadd.f32 %v2617_v58, %v2401_v13  ;;  %v2612_v44 = vadd.f32 %v4897_v59, %v2611_v42  ;;  %v2412_v35 = vld [vmem:[%s3858_s15 + $0x70] sm:$0xff] }
 0x392   : > { %v3517_v21 = vpop.f32.mrf.mxu0 }
 0x393   : > { %2824 = vst.msk [vmem:[%s4908_s19] sm:$0xff] %vm346_vm0, %v2792_v18  ;;  %v2795_v16 = vmax.f32 %v2763_v15, 0.0  ;;  %v2762_v7 = vadd.f32 %v2612_v44, %v2400_v5  ;;  %v2627_v19 = vadd.f32 %v3517_v21, %v4897_v59  ;;  %v2415_v18 = vld [vmem:[%s3858_s15 + $0x88] sm:$0xff] }
 0x394   : > { %v2621_v20 = vpop.f32.mrf.mxu0 }
 0x395   : > { %2827 = vst.msk [vmem:[%s4908_s19 + $0x18] sm:$0xff] %vm346_vm0, %v2795_v16  ;;  %v2794_v41 = vmax.f32 %v2762_v7, 0.0  ;;  %v2765_v53 = vadd.f32 %v2627_v19, %v2403_v9  ;;  %v2622_v22 = vadd.f32 %v4897_v59, %v2621_v20  ;;  %v2414_v16 = vld [vmem:[%s3858_s15 + $0x80] sm:$0xff] }
 0x396   : > { %v3520_v24 = vpop.f32.mrf.mxu0 }
 0x397   : > { %2826 = vst.msk [vmem:[%s4908_s19 + $0x10] sm:$0xff] %vm346_vm0, %v2794_v41  ;;  %v2797_v6 = vmax.f32 %v2765_v53, 0.0  ;;  %v2764_v52 = vadd.f32 %v2622_v22, %v2402_v61  ;;  %v2637_v25 = vadd.f32 %v3520_v24, %v4897_v59  ;;  %v2417_v41 = vld [vmem:[%s3858_s15 + $0x98] sm:$0xff] }
 0x398   : > { %v2631_v63 = vpop.f32.mrf.mxu0 }
 0x399   : > { %2829 = vst.msk [vmem:[%s4908_s19 + $0x28] sm:$0xff] %vm346_vm0, %v2797_v6  ;;  %v2796_v49 = vmax.f32 %v2764_v52, 0.0  ;;  %v2767_v43 = vadd.f32 %v2637_v25, %v2405_v23  ;;  %v2632_v48 = vadd.f32 %v4897_v59, %v2631_v63  ;;  %v2416_v6 = vld [vmem:[%s3858_s15 + $0x90] sm:$0xff] }
 0x39a   : > { %v3523_v46 = vpop.f32.mrf.mxu0 }
 0x39b   : > { %2828 = vst.msk [vmem:[%s4908_s19 + $0x20] sm:$0xff] %vm346_vm0, %v2796_v49  ;;  %v2799_v47 = vmax.f32 %v2767_v43, 0.0  ;;  %v2766_v34 = vadd.f32 %v2632_v48, %v2404_v0  ;;  %v2647_v17 = vadd.f32 %v3523_v46, %v4897_v59  ;;  %v2419_v49 = vld [vmem:[%s3858_s15 + $0xa8] sm:$0xff] }
 0x39c   : > { %v2641_v14 = vpop.f32.mrf.mxu0 }
 0x39d   : > { %2831 = vst.msk [vmem:[%s4908_s19 + $0x38] sm:$0xff] %vm346_vm0, %v2799_v47  ;;  %v2798_v3 = vmax.f32 %v2766_v34, 0.0  ;;  %v2769_v28 = vadd.f32 %v2647_v17, %v2407_v37  ;;  %v2642_v38 = vadd.f32 %v4897_v59, %v2641_v14  ;;  %v2418_v47 = vld [vmem:[%s3858_s15 + $0xa0] sm:$0xff] }
 0x39e   : > { %v3526_v60 = vpop.f32.mrf.mxu0 }
 0x39f   : > { %2830 = vst.msk [vmem:[%s4908_s19 + $0x30] sm:$0xff] %vm346_vm0, %v2798_v3  ;;  %v2801_v1 = vmax.f32 %v2769_v28, 0.0  ;;  %v2768_v32 = vadd.f32 %v2642_v38, %v2406_v2  ;;  %v2657_v8 = vadd.f32 %v3526_v60, %v4897_v59  ;;  %v2421_v3 = vld [vmem:[%s3858_s15 + $0xb8] sm:$0xff] }
 0x3a0   : > { %v2651_v57 = vpop.f32.mrf.mxu0 }
 0x3a1   : > { %2833 = vst.msk [vmem:[%s4908_s19 + $0x48] sm:$0xff] %vm346_vm0, %v2801_v1  ;;  %v2800_v56 = vmax.f32 %v2768_v32, 0.0  ;;  %v2771_v31 = vadd.f32 %v2657_v8, %v2409_v39  ;;  %v2652_v62 = vadd.f32 %v4897_v59, %v2651_v57  ;;  %v2420_v1 = vld [vmem:[%s3858_s15 + $0xb0] sm:$0xff] }
 0x3a2   : > { %v3529_v10 = vpop.f32.mrf.mxu0 }
 0x3a3   : > { %2832 = vst.msk [vmem:[%s4908_s19 + $0x40] sm:$0xff] %vm346_vm0, %v2800_v56  ;;  %v2803_v45 = vmax.f32 %v2771_v31, 0.0  ;;  %v2770_v54 = vadd.f32 %v2652_v62, %v2408_v4  ;;  %v2667_v50 = vadd.f32 %v3529_v10, %v4897_v59  ;;  %v2423_v56 = vld [vmem:[%s3858_s15 + $0xc8] sm:$0xff] }
 0x3a4   : > { %v2661_v27 = vpop.f32.mrf.mxu0 }
 0x3a5   : > { %2835 = vst.msk [vmem:[%s4908_s19 + $0x58] sm:$0xff] %vm346_vm0, %v2803_v45  ;;  %v2802_v40 = vmax.f32 %v2770_v54, 0.0  ;;  %v2773_v26 = vadd.f32 %v2667_v50, %v2411_v33  ;;  %v2662_v30 = vadd.f32 %v4897_v59, %v2661_v27  ;;  %v2422_v45 = vld [vmem:[%s3858_s15 + $0xc0] sm:$0xff] }
 0x3a6   : > { %v3532_v36 = vpop.f32.mrf.mxu0 }
 0x3a7   : > { %2834 = vst.msk [vmem:[%s4908_s19 + $0x50] sm:$0xff] %vm346_vm0, %v2802_v40  ;;  %v2805_v12 = vmax.f32 %v2773_v26, 0.0  ;;  %v2772_v13 = vadd.f32 %v2662_v30, %v2410_v29  ;;  %v2677_v51 = vadd.f32 %v3532_v36, %v4897_v59  ;;  %v2425_v40 = vld [vmem:[%s3858_s15 + $0xd8] sm:$0xff] }
 0x3a8   : > { %v2671_v55 = vpop.f32.mrf.mxu0 }
 0x3a9   : > { %2837 = vst.msk [vmem:[%s4908_s19 + $0x68] sm:$0xff] %vm346_vm0, %v2805_v12  ;;  %v2804_v58 = vmax.f32 %v2772_v13, 0.0  ;;  %v2775_v5 = vadd.f32 %v2677_v51, %v2413_v11  ;;  %v2672_v42 = vadd.f32 %v4897_v59, %v2671_v55  ;;  %v2424_v12 = vld [vmem:[%s3858_s15 + $0xd0] sm:$0xff] }
 0x3aa   : > { %v3535_v15 = vpop.f32.mrf.mxu0 }
 0x3ab   : > { %2836 = vst.msk [vmem:[%s4908_s19 + $0x60] sm:$0xff] %vm346_vm0, %v2804_v58  ;;  %v2807_v44 = vmax.f32 %v2775_v5, 0.0  ;;  %v2774_v9 = vadd.f32 %v2672_v42, %v2412_v35  ;;  %v2687_v21 = vadd.f32 %v3535_v15, %v4897_v59  ;;  %v2427_v58 = vld [vmem:[%s3858_s15 + $0xe8] sm:$0xff] }
 0x3ac   : > { %v2681_v7 = vpop.f32.mrf.mxu0 }
 0x3ad   : > { %2839 = vst.msk [vmem:[%s4908_s19 + $0x78] sm:$0xff] %vm346_vm0, %v2807_v44  ;;  %v2806_v19 = vmax.f32 %v2774_v9, 0.0  ;;  %v2777_v61 = vadd.f32 %v2687_v21, %v2415_v18  ;;  %v2682_v20 = vadd.f32 %v4897_v59, %v2681_v7  ;;  %v2426_v44 = vld [vmem:[%s3858_s15 + $0xe0] sm:$0xff] }
 0x3ae   : > { %v3538_v53 = vpop.f32.mrf.mxu0 }
 0x3af   : > { %2838 = vst.msk [vmem:[%s4908_s19 + $0x70] sm:$0xff] %vm346_vm0, %v2806_v19  ;;  %v2809_v22 = vmax.f32 %v2777_v61, 0.0  ;;  %v2776_v23 = vadd.f32 %v2682_v20, %v2414_v16  ;;  %v2697_v24 = vadd.f32 %v3538_v53, %v4897_v59  ;;  %v2429_v19 = vld [vmem:[%s3858_s15 + $0xf8] sm:$0xff] }
 0x3b0   : > { %v2691_v52 = vpop.f32.mrf.mxu0 }
 0x3b1   : > { %2841 = vst.msk [vmem:[%s4908_s19 + $0x88] sm:$0xff] %vm346_vm0, %v2809_v22  ;;  %v2808_v25 = vmax.f32 %v2776_v23, 0.0  ;;  %v2779_v0 = vadd.f32 %v2697_v24, %v2417_v41  ;;  %v2692_v63 = vadd.f32 %v4897_v59, %v2691_v52  ;;  %v2428_v22 = vld [vmem:[%s3858_s15 + $0xf0] sm:$0xff]  ;;  %s3641_s15 = scalar_lea.vmem %s5036_s8, 4096 }
 0x3b2   : > { %v3541_v43 = vpop.f32.mrf.mxu0  ;;  %p3642_p11 = scmp.ne.s32.totalorder %s5036_s8, %s3641_s15  ;;  %p3649_p7 = scmp.lt.s32.totalorder %s3647_s23, %s3641_s15 }
 0x3b3   : > { %2840 = vst.msk [vmem:[%s4908_s19 + $0x80] sm:$0xff] %vm346_vm0, %v2808_v25  ;;  %v2811_v48 = vmax.f32 %v2779_v0, 0.0  ;;  %v2778_v37 = vadd.f32 %v2692_v63, %v2416_v6  ;;  %v2707_v46 = vadd.f32 %v3541_v43, %v4897_v59 }
 0x3b4   : > { %v2701_v34 = vpop.f32.mrf.mxu0  ;;  %p3643_p13 = pnand %p3642_p11, %p5100_p12  ;;  %p3650_p8 = por %p3649_p7, %p3648_p5 }
 0x3b5   : > { %2843 = vst.msk [vmem:[%s4908_s19 + $0x98] sm:$0xff] %vm346_vm0, %v2811_v48  ;;  %v2810_v17 = vmax.f32 %v2778_v37, 0.0  ;;  %v2781_v2 = vadd.f32 %v2707_v46, %v2419_v49  ;;  %v2702_v14 = vadd.f32 %v4897_v59, %v2701_v34 }
 0x3b6   : > { %v3544_v28 = vpop.f32.mrf.mxu0  ;;  %p3644_p4 = pneg %p3643_p13 }
 0x3b7   : > { %2842 = vst.msk [vmem:[%s4908_s19 + $0x90] sm:$0xff] %vm346_vm0, %v2810_v17  ;;  %v2813_v38 = vmax.f32 %v2781_v2, 0.0  ;;  %v2780_v39 = vadd.f32 %v2702_v14, %v2418_v47  ;;  %v2717_v60 = vadd.f32 %v3544_v28, %v4897_v59 }
 0x3b8   : > { %v2711_v32 = vpop.f32.mrf.mxu0  ;;  %p3651_p10 = pnand %p3650_p8, %p3644_p4 }
 0x3b9   : > { %2845 = vst.msk [vmem:[%s4908_s19 + $0xa8] sm:$0xff] %vm346_vm0, %v2813_v38  ;;  %v2812_v8 = vmax.f32 %v2780_v39, 0.0  ;;  %v2783_v4 = vadd.f32 %v2717_v60, %v2421_v3  ;;  %v2712_v57 = vadd.f32 %v4897_v59, %v2711_v32 }
 0x3ba   : > { %v3547_v31 = vpop.f32.mrf.mxu0 }
 0x3bb   : > { %2844 = vst.msk [vmem:[%s4908_s19 + $0xa0] sm:$0xff] %vm346_vm0, %v2812_v8  ;;  %v2815_v62 = vmax.f32 %v2783_v4, 0.0  ;;  %v2782_v33 = vadd.f32 %v2712_v57, %v2420_v1  ;;  %v2727_v10 = vadd.f32 %v3547_v31, %v4897_v59 }
 0x3bc   : > { %v2721_v54 = vpop.f32.mrf.mxu0 }
 0x3bd   : > { %2847 = vst.msk [vmem:[%s4908_s19 + $0xb8] sm:$0xff] %vm346_vm0, %v2815_v62  ;;  %v2814_v50 = vmax.f32 %v2782_v33, 0.0  ;;  %v2785_v29 = vadd.f32 %v2727_v10, %v2423_v56  ;;  %v2722_v27 = vadd.f32 %v4897_v59, %v2721_v54 }
 0x3be   : > { %v3550_v26 = vpop.f32.mrf.mxu0 }
 0x3bf   : > { %2846 = vst.msk [vmem:[%s4908_s19 + $0xb0] sm:$0xff] %vm346_vm0, %v2814_v50  ;;  %v2817_v30 = vmax.f32 %v2785_v29, 0.0  ;;  %v2784_v11 = vadd.f32 %v2722_v27, %v2422_v45  ;;  %v2737_v36 = vadd.f32 %v3550_v26, %v4897_v59 }
 0x3c0   : > { %v2731_v13 = vpop.f32.mrf.mxu0 }
 0x3c1   : > { %2849 = vst.msk [vmem:[%s4908_s19 + $0xc8] sm:$0xff] %vm346_vm0, %v2817_v30  ;;  %v2816_v51 = vmax.f32 %v2784_v11, 0.0  ;;  %v2787_v35 = vadd.f32 %v2737_v36, %v2425_v40  ;;  %v2732_v55 = vadd.f32 %v4897_v59, %v2731_v13 }
 0x3c2   : > { %v3553_v5 = vpop.f32.mrf.mxu0 }
 0x3c3   : > { %2848 = vst.msk [vmem:[%s4908_s19 + $0xc0] sm:$0xff] %vm346_vm0, %v2816_v51  ;;  %v2819_v42 = vmax.f32 %v2787_v35, 0.0  ;;  %v2786_v18 = vadd.f32 %v2732_v55, %v2424_v12  ;;  %v2747_v15 = vadd.f32 %v3553_v5, %v4897_v59 }
 0x3c4   : > { %v2741_v9 = vpop.f32.mrf.mxu0 }
 0x3c5   : > { %2851 = vst.msk [vmem:[%s4908_s19 + $0xd8] sm:$0xff] %vm346_vm0, %v2819_v42  ;;  %v2818_v21 = vmax.f32 %v2786_v18, 0.0  ;;  %v2789_v16 = vadd.f32 %v2747_v15, %v2427_v58  ;;  %v2742_v7 = vadd.f32 %v4897_v59, %v2741_v9 }
 0x3c6   : > { %v3556_v61 = vpop.f32.mrf.mxu0 }
 0x3c7   : > { %2850 = vst.msk [vmem:[%s4908_s19 + $0xd0] sm:$0xff] %vm346_vm0, %v2818_v21  ;;  %v2821_v20 = vmax.f32 %v2789_v16, 0.0  ;;  %v2788_v41 = vadd.f32 %v2742_v7, %v2426_v44  ;;  %v2757_v53 = vadd.f32 %v3556_v61, %v4897_v59 }
 0x3c8   : > { %v2751_v23 = vpop.f32.mrf.mxu0 }
 0x3c9   : > { %2853 = vst.msk [vmem:[%s4908_s19 + $0xe8] sm:$0xff] %vm346_vm0, %v2821_v20  ;;  %v2820_v24 = vmax.f32 %v2788_v41, 0.0  ;;  %v2791_v6 = vadd.f32 %v2757_v53, %v2429_v19  ;;  %v2752_v52 = vadd.f32 %v4897_v59, %v2751_v23 }
 0x3cb   : > { %2852 = vst.msk [vmem:[%s4908_s19 + $0xe0] sm:$0xff] %vm346_vm0, %v2820_v24  ;;  %v2823_v25 = vmax.f32 %v2791_v6, 0.0  ;;  %v2790_v0 = vadd.f32 %v2752_v52, %v2428_v22 }
 0x3cd   : > { %2855 = vst.msk [vmem:[%s4908_s19 + $0xf8] sm:$0xff] %vm346_vm0, %v2823_v25  ;;  %v2822_v63 = vmax.f32 %v2790_v0, 0.0 }
 0x3cf   : > { %2854 = vst.msk [vmem:[%s4908_s19 + $0xf0] sm:$0xff] %vm346_vm0, %v2822_v63 }
 0x3d0   : > { %3654 = shalt.err (!%p3651_p10)
}
 0x3d1   : > { %s3655_s29 = scalar_lea.hbm %s5032_s18, 4096  ;;  %s3659_s11 = scalar_lea.hbm %s5089_s7, 8192 }
 0x3d2   : > { %p3656_p0 = scmp.ne.s32.totalorder %s5032_s18, %s3655_s29  ;;  %p3660_p1 = scmp.lt.s32.totalorder %s5032_s18, %s5089_s7 }
 0x3d3   : > { %p3661_p3 = scmp.lt.s32.totalorder %s3659_s11, %s3655_s29 }
 0x3d4   : > { %p3657_p2 = pnand %p3656_p0, %p5100_p12 }
 0x3d5   : > { %p3662_p6 = por %p3661_p3, %p3660_p1 }
 0x3d6   : > { %p3658_p9 = pneg %p3657_p2 }
 0x3d8   : > { %p3663_p11 = pnand %p3662_p6, %p3658_p9 }
 0x3da   : > { %3666 = shalt.err (!%p3663_p11)
}
 0x3db   : > { %s3714_s15 = smov 128  }
 0x3dc   : > { %3563 = dma.vmem_to_hbm [thread:$0]  (%p5100_p12), %s5036_s8, 4096, %s5032_s18, %s2857_s28, %s3714_s15, %s3714_s15, %s3711_s9  }
 0x3dd PF: > { %s2885_s20 = sand.u32 1, %s3693_s24   ;;  %p5101_p13 = scmp.ne.s32.totalorder %s5095_s14, 0 }
 0x3de   : > { %p5102_p4 = scmp.ge.s32.totalorder %s3705_s27, 2  ;;  %s2886_s22 = scalar_lea.sflag [#allocation5], %s2885_s20 }
 0x3e0   : > { %p3570_p5 = pnand %p5102_p4, %p5101_p13 }
 0x3e2   : > { %p3571_p7 = pneg %p3570_p5 }
 0x3e4   : > { %3688 = dma.done.wait (%p3571_p7), %s2886_s22, 4096  }
 0x3e5   : > { %3690 = vsyncadd (%p3571_p7), %s2886_s22, 4294963200  ;;  %p20_p8 = scmp.ge.s32.totalorder %s3780_s30, 4   ;;  %s5103_s24 = smov %s3697_s25 }
 0x3e6   : > { %s5104_s25 = smov %s3701_s26  ;;  %s5105_s26 = smov %s3792_s10 }
 0x3e7   : > { %s5106_s27 = smov %s3780_s30  ;;  %22 = sbr.rel (!%p20_p8) target bundleno = 5 (0x5), region = 98 }
 0x3ec   :  { %2891 = vsyncpa [#allocation4], 1 }
 0x3ed   :  { %2893 = vsyncpa [#allocation4 + $0x1], 1 }
 0x3ee   :  { %2894 = vsyncpa [#allocation5], 1 }
 0x3ef   :  { %2896 = vsyncpa [#allocation5 + $0x1], 1 }

</bundles_post_ra>
